<compile_context>
chip_gen: v6e
topology: v6e:2x2x1
jax: 0.10.0
libtpu: 0.0.40
codegen_flags: <defaults>
</compile_context>

<pallas_src>
import functools

import numpy as np

import jax
import jax.numpy as jnp
from jax import lax
from jax.experimental import pallas as pl
from jax.experimental.pallas import tpu as pltpu


# ---------------------------------------------------------------------------
# Static architecture constants
# ---------------------------------------------------------------------------
C_IN, C1, C2 = 4, 8, 16        # channels (conv1 input zero-padded 4 -> 8)
H, W = 16, 16                  # input spatial
HP, WP = H + 2, W + 2          # conv1 padded spatial (18, 18)
H2, W2 = 8, 8                  # spatial after MaxPool2d(2)
HP2, WP2 = H2 + 2, W2 + 2      # conv2 padded spatial (10, 10)
FC_IN, FC_OUT = 4, 8           # Linear acts on the last (width) axis: 4 -> 8

# Lane-flattened padded-grid layouts (spatial flattened into the lane dim).
PAD1_LANES = 384               # >= HP*WP + max conv1 tap slice end (326); 128-aligned
ACC1_LANES = 288               # conv1 output window (covers lane 18*15+15 = 285)
PAD2_LANES = 128               # conv2 padded-grid lanes (>= max tap slice end 102)
ACC2_LANES = 80                # conv2 output window (covers lane 10*7+7 = 77)
VMAX_W = 268                   # vertical-max width (covers lane 18*14+14+1 = 267)
SEL_SRC = 267                  # compaction-matmul K (max source lane 2*(18*7+7)=266)
OUT_LANES = 4 * 4 * FC_OUT     # 4 images x (4 output rows x 8 features) = 128

CONV1_SHIFTS = tuple(WP * kh + kw for kh in range(3) for kw in range(3))
CONV2_SHIFTS = tuple(WP2 * kh + kw for kh in range(3) for kw in range(3))


# ---------------------------------------------------------------------------
# The single fused forward kernel (B_BLK images per grid step)
# ---------------------------------------------------------------------------
def _fused_forward_kernel(b_blk, x_ref, w1_ref, b1_ref, sel_ref, w2_ref,
                          b2_ref, pfc_ref, fcb_ref, o_ref):
    f32, bf16 = jnp.float32, jnp.bfloat16
    w1 = w1_ref[...]           # (8, 72)    bf16, tap-stacked conv1 weights
    w2 = w2_ref[...]           # (16, 72)   bf16, tap-stacked conv2 weights
    sel = sel_ref[...]         # (267, 128) bf16, one-hot maxpool compaction
    pfc = pfc_ref[...]         # (320, 128) bf16, avgpool+Linear, blockdiag x4 images
    b1 = b1_ref[...]           # (8, 1)  f32
    b2 = b2_ref[...]           # (16, 1) f32

    a2s = []
    for b in range(b_blk):                       # unrolled: B_BLK images/step
        xi = x_ref[b]                            # (8, 384) f32, pre-padded on host

        # --- Conv2d(4->8, 3x3, pad 1) + ReLU: one tap-stacked MXU matmul ----
        # RHS row t*8+ci = padded input lane (r + shift_t) for channel ci.
        rhs1 = jnp.concatenate(
            [xi[:, s:s + ACC1_LANES] for s in CONV1_SHIFTS], axis=0
        ).astype(bf16)                                                # (72, 288)
        a1 = jnp.maximum(
            jnp.dot(w1, rhs1, preferred_element_type=f32) + b1, 0.0)  # (8, 288) f32

        # --- MaxPool2d(2): two exact f32 VPU maxes + one one-hot compaction
        #     matmul that also places the result into conv2's padded layout.
        vmax = jnp.maximum(a1[:, 0:VMAX_W], a1[:, WP:WP + VMAX_W])        # (8, 268)
        hmax = jnp.maximum(vmax[:, 0:SEL_SRC], vmax[:, 1:SEL_SRC + 1])    # (8, 267)
        p2 = jnp.dot(hmax.astype(bf16), sel,
                     preferred_element_type=f32)                         # (8, 128)

        # --- Conv2d(8->16, 3x3, pad 1) + Tanh: one tap-stacked MXU matmul ---
        rhs2 = jnp.concatenate(
            [p2[:, s:s + ACC2_LANES] for s in CONV2_SHIFTS], axis=0
        ).astype(bf16)                                                # (72, 80)
        a2s.append(jnp.tanh(
            jnp.dot(w2, rhs2, preferred_element_type=f32) + b2))      # (16, 80) f32

    # --- AvgPool2d(2) + Linear(4->8) + bias + Sigmoid: one fused matmul per
    #     group of 4 images (block-diag pfc) -> lane-dense (b_blk*4, 128) out.
    zs = []
    for g in range(b_blk // 4):
        lhs = jnp.concatenate(a2s[4 * g:4 * g + 4], axis=1).astype(bf16)   # (16, 320)
        zs.append(jnp.dot(lhs, pfc, preferred_element_type=f32))           # (16, 128)
    z = zs[0] if len(zs) == 1 else jnp.concatenate(zs, axis=0)
    o_ref[...] = jax.nn.sigmoid(z + fcb_ref[...])                          # (b_blk*4, 128)


# ---------------------------------------------------------------------------
# Host-side (XLA) preprocessing — all constants / layout plumbing hoisted here
# ---------------------------------------------------------------------------
def _pick_blocking(n):
    """Images per grid step and padded batch size.

    B_BLK is a multiple of 4 (4 images share one lane-dense 128-wide output
    group) and the grid is kept >= 2 steps so both v7x TensorCores get work;
    on single-TC v5e/v6e the extra (padded) step is harmless.
    """
    b_blk = min(8, max(4, 4 * ((n + 7) // 8)))
    n_steps = max(2, -(-n // b_blk))
    return b_blk, n_steps * b_blk


def _prepad_input(x, n_pad):
    """(N,4,16,16) -> (n_pad, 8, PAD1_LANES): batch padded, Cin zero-padded
    4->8, spatial zero-padded to 18x18, lane-flattened (lane = 18*(h+1)+(w+1)),
    lane tail zero-padded to 384.  Done in XLA so the kernel needs no scatter
    or per-step zero fill."""
    n = x.shape[0]
    xp = jnp.pad(x.astype(jnp.float32),
                 ((0, n_pad - n), (0, C1 - C_IN), (1, 1), (1, 1)))
    xp = xp.reshape(n_pad, C1, HP * WP)
    return jnp.pad(xp, ((0, 0), (0, 0), (0, PAD1_LANES - HP * WP)))


def _prepare_params(params):
    f32, bf16 = jnp.float32, jnp.bfloat16

    # Conv weights, tap-stacked: column index = (kh*3 + kw)*8 + cin
    # (conv1 cin zero-padded 4 -> 8 so the contraction dim is sublane aligned).
    w1 = jnp.transpose(params["conv1_w"], (0, 2, 3, 1))            # (8,3,3,4)
    w1 = jnp.pad(w1, ((0, 0), (0, 0), (0, 0), (0, C1 - C_IN)))     # (8,3,3,8)
    w1s = w1.reshape(C1, 9 * C1).astype(bf16)                      # (8, 72)
    w2s = jnp.transpose(params["conv2_w"], (0, 2, 3, 1)).reshape(C2, 9 * C1).astype(bf16)
    b1 = params["conv1_b"].reshape(C1, 1).astype(f32)
    b2 = params["conv2_b"].reshape(C2, 1).astype(f32)

    # MaxPool compaction: one-hot gather from the 2x2-max lane 2*(WP*h2 + w2)
    # to conv2's zero-padded lane WP2*(h2+1)+(w2+1).  Exactly one 1 per
    # interior column (exact gather); padding columns are all-zero (exact 0),
    # so no non-negativity assumption on the activations is required.
    sel = np.zeros((SEL_SRC, PAD2_LANES), np.float32)
    for h2 in range(H2):
        for w2 in range(W2):
            sel[2 * (WP * h2 + w2), WP2 * (h2 + 1) + (w2 + 1)] = 1.0

    # AvgPool2d(2) fused with Linear(4->8) acting on the width axis:
    #   pavg: conv2 output lane WP2*h2 + w2 -> pooled cell 4*h3 + w3 (x 0.25)
    #   kron(I4, fc_w^T): pooled cell -> output lane 8*h3 + f
    # pfc_bd block-diagonalises over 4 images so one matmul emits a lane-dense
    # 128-wide output group.
    pavg = np.zeros((ACC2_LANES, 16), np.float32)
    for h3 in range(4):
        for w3 in range(4):
            for dh in range(2):
                for dw in range(2):
                    pavg[WP2 * (2 * h3 + dh) + (2 * w3 + dw), 4 * h3 + w3] = 0.25
    fc_wt = params["fc_w"].T.astype(f32)                                    # (4, 8)
    pfc = jnp.asarray(pavg) @ jnp.kron(jnp.eye(4, dtype=f32), fc_wt)        # (80, 32)
    pfc_bd = jnp.kron(jnp.eye(4, dtype=f32), pfc).astype(bf16)              # (320, 128)
    fcb = jnp.tile(params["fc_b"].astype(f32), 16).reshape(1, OUT_LANES)    # (1, 128)

    return dict(w1s=w1s, b1=b1, sel=jnp.asarray(sel, dtype=bf16),
                w2s=w2s, b2=b2, pfc_bd=pfc_bd, fcb=fcb)


# ---------------------------------------------------------------------------
# NNModel forward: one fused Pallas call, batch-blocked parallel grid
# ---------------------------------------------------------------------------
def nn_model_forward(x, params):
    n = x.shape[0]
    assert x.shape[1:] == (C_IN, H, W), x.shape
    b_blk, n_pad = _pick_blocking(n)
    grid_n = n_pad // b_blk

    p = _prepare_params(params)
    xp = _prepad_input(x, n_pad)                    # (n_pad, 8, 384) f32

    out2d = pl.pallas_call(
        functools.partial(_fused_forward_kernel, b_blk),
        out_shape=jax.ShapeDtypeStruct((n_pad * 4, OUT_LANES), jnp.float32),
        grid=(grid_n,),
        in_specs=[
            pl.BlockSpec((b_blk, C1, PAD1_LANES), lambda i: (i, 0, 0)),    # x (pre-padded)
            pl.BlockSpec((C1, 9 * C1), lambda i: (0, 0)),                  # conv1 w (stacked)
            pl.BlockSpec((C1, 1), lambda i: (0, 0)),                       # conv1 b
            pl.BlockSpec((SEL_SRC, PAD2_LANES), lambda i: (0, 0)),         # maxpool compaction
            pl.BlockSpec((C2, 9 * C1), lambda i: (0, 0)),                  # conv2 w (stacked)
            pl.BlockSpec((C2, 1), lambda i: (0, 0)),                       # conv2 b
            pl.BlockSpec((4 * ACC2_LANES, OUT_LANES), lambda i: (0, 0)),   # avgpool+fc (x4 imgs)
            pl.BlockSpec((1, OUT_LANES), lambda i: (0, 0)),                # fc bias (tiled)
        ],
        out_specs=pl.BlockSpec((b_blk * 4, OUT_LANES), lambda i: (i, 0)),
        compiler_params=pltpu.CompilerParams(
            dimension_semantics=("parallel",),      # batch blocks across TCs (v7x)
        ),
    )(xp, p["w1s"], p["b1"], p["sel"], p["w2s"], p["b2"], p["pfc_bd"], p["fcb"])

    # Output layout: row = step*(4*b_blk) + group*16 + channel,
    #                lane = img_in_group*32 + h_out*8 + feature.
    out = out2d.reshape(grid_n, b_blk // 4, C2, 4, 4, FC_OUT)
    out = jnp.transpose(out, (0, 1, 3, 2, 4, 5)).reshape(n_pad, C2, 4, FC_OUT)
    return out[:n]


# ---------------------------------------------------------------------------
# Pure-JAX reference (f32) for correctness checking
# ---------------------------------------------------------------------------
def _conv_ref(x, w, b):
    y = lax.conv_general_dilated(
        x, w, window_strides=(1, 1), padding=((1, 1), (1, 1)),
        dimension_numbers=("NCHW", "OIHW", "NCHW"))
    return y + b[None, :, None, None]


def _maxpool_ref(x):
    return lax.reduce_window(x, -jnp.inf, lax.max, (1, 1, 2, 2),
                             (1, 1, 2, 2), "VALID")


def _avgpool_ref(x):
    return lax.reduce_window(x, 0.0, lax.add, (1, 1, 2, 2),
                             (1, 1, 2, 2), "VALID") * 0.25


def nn_model_reference(x, params):
    x = jnp.maximum(_conv_ref(x, params["conv1_w"], params["conv1_b"]), 0.0)
    x = _maxpool_ref(x)
    x = jnp.tanh(_conv_ref(x, params["conv2_w"], params["conv2_b"]))
    x = _avgpool_ref(x)
    return jax.nn.sigmoid(jnp.einsum("nchw,ow->ncho", x, params["fc_w"])
                          + params["fc_b"])


if __name__ == "__main__":
    key = jax.random.PRNGKey(0)
    kx, k1, k2, k3, k4, k5, k6 = jax.random.split(key, 7)

    # Input: batch=2, channels=4, spatial=16x16 (NCHW, like PyTorch).
    x = jax.random.normal(kx, (2, C_IN, H, W), dtype=jnp.float32)

    params = {
        "conv1_w": jax.random.normal(k1, (C1, C_IN, 3, 3), jnp.float32) * 0.1,
        "conv1_b": jax.random.normal(k2, (C1,), jnp.float32) * 0.1,
        "conv2_w": jax.random.normal(k3, (C2, C1, 3, 3), jnp.float32) * 0.1,
        "conv2_b": jax.random.normal(k4, (C2,), jnp.float32) * 0.1,
        "fc_w": jax.random.normal(k5, (FC_OUT, FC_IN), jnp.float32) * 0.1,  # (out, in)
        "fc_b": jax.random.normal(k6, (FC_OUT,), jnp.float32) * 0.1,
    }

    fwd = jax.jit(nn_model_forward)
    out = jax.block_until_ready(fwd(x, params))
    ref = jax.block_until_ready(nn_model_reference(x, params))

    assert out.shape == (2, C2, 4, FC_OUT), out.shape
    # bf16 MXU operands (f32 accumulation, f32 max/activations) -> bf16-level tol.
    max_err = float(jnp.max(jnp.abs(out - ref)))
    assert jnp.allclose(out, ref, atol=2e-3, rtol=2e-3), max_err

    print("KERNEL_OK")
</pallas_src>

<mosaic_0001>
module attributes {stable_mosaic.version = 11 : i64} {
  func.func @_fused_forward_kernel(%arg0: i32, %arg1: memref<4x8x384xf32, #tpu.memory_space<vmem>>, %arg2: memref<8x72xbf16, #tpu.memory_space<vmem>>, %arg3: memref<8x1xf32, #tpu.memory_space<vmem>>, %arg4: memref<267x128xbf16, #tpu.memory_space<vmem>>, %arg5: memref<16x72xbf16, #tpu.memory_space<vmem>>, %arg6: memref<16x1xf32, #tpu.memory_space<vmem>>, %arg7: memref<320x128xbf16, #tpu.memory_space<vmem>>, %arg8: memref<1x128xf32, #tpu.memory_space<vmem>>, %arg9: memref<16x128xf32, #tpu.memory_space<vmem>>) attributes {dimension_semantics = [#tpu.dimension_semantics<parallel>], iteration_bounds = array<i64: 2>, scalar_prefetch = 0 : i64, scratch_operands = 0 : i64, tpu.core_type = #tpu.core_type<tc>, window_params = [{transform_indices = @transform_0, window_bounds = array<i64: 4, 8, 384>}, {pipeline_mode = #tpu.pipeline_mode<synchronous>, transform_indices = @transform_1, window_bounds = array<i64: 8, 72>}, {pipeline_mode = #tpu.pipeline_mode<synchronous>, transform_indices = @transform_2, window_bounds = array<i64: 8, 1>}, {pipeline_mode = #tpu.pipeline_mode<synchronous>, transform_indices = @transform_3, window_bounds = array<i64: 267, 128>}, {pipeline_mode = #tpu.pipeline_mode<synchronous>, transform_indices = @transform_4, window_bounds = array<i64: 16, 72>}, {pipeline_mode = #tpu.pipeline_mode<synchronous>, transform_indices = @transform_5, window_bounds = array<i64: 16, 1>}, {pipeline_mode = #tpu.pipeline_mode<synchronous>, transform_indices = @transform_6, window_bounds = array<i64: 320, 128>}, {pipeline_mode = #tpu.pipeline_mode<synchronous>, transform_indices = @transform_7, window_bounds = array<i64: 1, 128>}, {transform_indices = @transform_8, window_bounds = array<i64: 16, 128>}]} {
    %c0 = arith.constant 0 : index
    %c0_0 = arith.constant 0 : index
    %0 = vector.load %arg2[%c0, %c0_0] : memref<8x72xbf16, #tpu.memory_space<vmem>>, vector<8x72xbf16>
    %c0_1 = arith.constant 0 : index
    %c0_2 = arith.constant 0 : index
    %1 = vector.load %arg5[%c0_1, %c0_2] : memref<16x72xbf16, #tpu.memory_space<vmem>>, vector<16x72xbf16>
    %c0_3 = arith.constant 0 : index
    %c0_4 = arith.constant 0 : index
    %2 = vector.load %arg4[%c0_3, %c0_4] : memref<267x128xbf16, #tpu.memory_space<vmem>>, vector<267x128xbf16>
    %c0_5 = arith.constant 0 : index
    %c0_6 = arith.constant 0 : index
    %3 = vector.load %arg7[%c0_5, %c0_6] : memref<320x128xbf16, #tpu.memory_space<vmem>>, vector<320x128xbf16>
    %c0_7 = arith.constant 0 : index
    %c0_8 = arith.constant 0 : index
    %4 = vector.load %arg3[%c0_7, %c0_8] : memref<8x1xf32, #tpu.memory_space<vmem>>, vector<8x1xf32>
    %c0_9 = arith.constant 0 : index
    %c0_10 = arith.constant 0 : index
    %5 = vector.load %arg6[%c0_9, %c0_10] : memref<16x1xf32, #tpu.memory_space<vmem>>, vector<16x1xf32>
    %c0_11 = arith.constant 0 : index
    %c0_12 = arith.constant 0 : index
    %c0_13 = arith.constant 0 : index
    %6 = vector.load %arg1[%c0_11, %c0_12, %c0_13] : memref<4x8x384xf32, #tpu.memory_space<vmem>>, vector<1x8x384xf32>
    %7 = vector.shape_cast %6 : vector<1x8x384xf32> to vector<8x384xf32>
    %8 = vector.extract_strided_slice %7 {offsets = [0, 0], sizes = [8, 288], strides = [1, 1]} : vector<8x384xf32> to vector<8x288xf32>
    %9 = vector.extract_strided_slice %7 {offsets = [0, 1], sizes = [8, 288], strides = [1, 1]} : vector<8x384xf32> to vector<8x288xf32>
    %10 = vector.extract_strided_slice %7 {offsets = [0, 2], sizes = [8, 288], strides = [1, 1]} : vector<8x384xf32> to vector<8x288xf32>
    %11 = vector.extract_strided_slice %7 {offsets = [0, 18], sizes = [8, 288], strides = [1, 1]} : vector<8x384xf32> to vector<8x288xf32>
    %12 = vector.extract_strided_slice %7 {offsets = [0, 19], sizes = [8, 288], strides = [1, 1]} : vector<8x384xf32> to vector<8x288xf32>
    %13 = vector.extract_strided_slice %7 {offsets = [0, 20], sizes = [8, 288], strides = [1, 1]} : vector<8x384xf32> to vector<8x288xf32>
    %14 = vector.extract_strided_slice %7 {offsets = [0, 36], sizes = [8, 288], strides = [1, 1]} : vector<8x384xf32> to vector<8x288xf32>
    %15 = vector.extract_strided_slice %7 {offsets = [0, 37], sizes = [8, 288], strides = [1, 1]} : vector<8x384xf32> to vector<8x288xf32>
    %16 = vector.extract_strided_slice %7 {offsets = [0, 38], sizes = [8, 288], strides = [1, 1]} : vector<8x384xf32> to vector<8x288xf32>
    %17 = tpu.concatenate %8, %9, %10, %11, %12, %13, %14, %15, %16 in 0 : vector<8x288xf32>, vector<8x288xf32>, vector<8x288xf32>, vector<8x288xf32>, vector<8x288xf32>, vector<8x288xf32>, vector<8x288xf32>, vector<8x288xf32>, vector<8x288xf32> -> vector<72x288xf32>
    %18 = arith.truncf %17 : vector<72x288xf32> to vector<72x288xbf16>
    %cst = arith.constant dense<0.000000e+00> : vector<8x288xf32>
    %19 = tpu.matmul %0, %18, %cst {dimension_numbers = #tpu.dot_dimension_numbers<[1], [0], [0], [1], [0, 0, 1, 1], [], []>} : vector<8x72xbf16>, vector<72x288xbf16>, vector<8x288xf32> -> vector<8x288xf32>
    %20 = vector.broadcast %4 : vector<8x1xf32> to vector<8x288xf32>
    %21 = arith.addf %19, %20 : vector<8x288xf32>
    %cst_14 = arith.constant 0.000000e+00 : f32
    %22 = vector.broadcast %cst_14 : f32 to vector<8x288xf32>
    %23 = arith.maximumf %21, %22 : vector<8x288xf32>
    %24 = vector.extract_strided_slice %23 {offsets = [0, 0], sizes = [8, 268], strides = [1, 1]} : vector<8x288xf32> to vector<8x268xf32>
    %25 = vector.extract_strided_slice %23 {offsets = [0, 18], sizes = [8, 268], strides = [1, 1]} : vector<8x288xf32> to vector<8x268xf32>
    %26 = arith.maximumf %24, %25 : vector<8x268xf32>
    %27 = vector.extract_strided_slice %26 {offsets = [0, 0], sizes = [8, 267], strides = [1, 1]} : vector<8x268xf32> to vector<8x267xf32>
    %28 = vector.extract_strided_slice %26 {offsets = [0, 1], sizes = [8, 267], strides = [1, 1]} : vector<8x268xf32> to vector<8x267xf32>
    %29 = arith.maximumf %27, %28 : vector<8x267xf32>
    %30 = arith.truncf %29 : vector<8x267xf32> to vector<8x267xbf16>
    %cst_15 = arith.constant dense<0.000000e+00> : vector<8x128xf32>
    %31 = tpu.matmul %30, %2, %cst_15 {dimension_numbers = #tpu.dot_dimension_numbers<[1], [0], [0], [1], [0, 0, 1, 1], [], []>} : vector<8x267xbf16>, vector<267x128xbf16>, vector<8x128xf32> -> vector<8x128xf32>
    %32 = vector.extract_strided_slice %31 {offsets = [0, 0], sizes = [8, 80], strides = [1, 1]} : vector<8x128xf32> to vector<8x80xf32>
    %33 = vector.extract_strided_slice %31 {offsets = [0, 1], sizes = [8, 80], strides = [1, 1]} : vector<8x128xf32> to vector<8x80xf32>
    %34 = vector.extract_strided_slice %31 {offsets = [0, 2], sizes = [8, 80], strides = [1, 1]} : vector<8x128xf32> to vector<8x80xf32>
    %35 = vector.extract_strided_slice %31 {offsets = [0, 10], sizes = [8, 80], strides = [1, 1]} : vector<8x128xf32> to vector<8x80xf32>
    %36 = vector.extract_strided_slice %31 {offsets = [0, 11], sizes = [8, 80], strides = [1, 1]} : vector<8x128xf32> to vector<8x80xf32>
    %37 = vector.extract_strided_slice %31 {offsets = [0, 12], sizes = [8, 80], strides = [1, 1]} : vector<8x128xf32> to vector<8x80xf32>
    %38 = vector.extract_strided_slice %31 {offsets = [0, 20], sizes = [8, 80], strides = [1, 1]} : vector<8x128xf32> to vector<8x80xf32>
    %39 = vector.extract_strided_slice %31 {offsets = [0, 21], sizes = [8, 80], strides = [1, 1]} : vector<8x128xf32> to vector<8x80xf32>
    %40 = vector.extract_strided_slice %31 {offsets = [0, 22], sizes = [8, 80], strides = [1, 1]} : vector<8x128xf32> to vector<8x80xf32>
    %41 = tpu.concatenate %32, %33, %34, %35, %36, %37, %38, %39, %40 in 0 : vector<8x80xf32>, vector<8x80xf32>, vector<8x80xf32>, vector<8x80xf32>, vector<8x80xf32>, vector<8x80xf32>, vector<8x80xf32>, vector<8x80xf32>, vector<8x80xf32> -> vector<72x80xf32>
    %42 = arith.truncf %41 : vector<72x80xf32> to vector<72x80xbf16>
    %cst_16 = arith.constant dense<0.000000e+00> : vector<16x80xf32>
    %43 = tpu.matmul %1, %42, %cst_16 {dimension_numbers = #tpu.dot_dimension_numbers<[1], [0], [0], [1], [0, 0, 1, 1], [], []>} : vector<16x72xbf16>, vector<72x80xbf16>, vector<16x80xf32> -> vector<16x80xf32>
    %44 = vector.broadcast %5 : vector<16x1xf32> to vector<16x80xf32>
    %45 = arith.addf %43, %44 : vector<16x80xf32>
    %46 = math.tanh %45 : vector<16x80xf32>
    %c1 = arith.constant 1 : index
    %c0_17 = arith.constant 0 : index
    %c0_18 = arith.constant 0 : index
    %47 = vector.load %arg1[%c1, %c0_17, %c0_18] : memref<4x8x384xf32, #tpu.memory_space<vmem>>, vector<1x8x384xf32>
    %48 = vector.shape_cast %47 : vector<1x8x384xf32> to vector<8x384xf32>
    %49 = vector.extract_strided_slice %48 {offsets = [0, 0], sizes = [8, 288], strides = [1, 1]} : vector<8x384xf32> to vector<8x288xf32>
    %50 = vector.extract_strided_slice %48 {offsets = [0, 1], sizes = [8, 288], strides = [1, 1]} : vector<8x384xf32> to vector<8x288xf32>
    %51 = vector.extract_strided_slice %48 {offsets = [0, 2], sizes = [8, 288], strides = [1, 1]} : vector<8x384xf32> to vector<8x288xf32>
    %52 = vector.extract_strided_slice %48 {offsets = [0, 18], sizes = [8, 288], strides = [1, 1]} : vector<8x384xf32> to vector<8x288xf32>
    %53 = vector.extract_strided_slice %48 {offsets = [0, 19], sizes = [8, 288], strides = [1, 1]} : vector<8x384xf32> to vector<8x288xf32>
    %54 = vector.extract_strided_slice %48 {offsets = [0, 20], sizes = [8, 288], strides = [1, 1]} : vector<8x384xf32> to vector<8x288xf32>
    %55 = vector.extract_strided_slice %48 {offsets = [0, 36], sizes = [8, 288], strides = [1, 1]} : vector<8x384xf32> to vector<8x288xf32>
    %56 = vector.extract_strided_slice %48 {offsets = [0, 37], sizes = [8, 288], strides = [1, 1]} : vector<8x384xf32> to vector<8x288xf32>
    %57 = vector.extract_strided_slice %48 {offsets = [0, 38], sizes = [8, 288], strides = [1, 1]} : vector<8x384xf32> to vector<8x288xf32>
    %58 = tpu.concatenate %49, %50, %51, %52, %53, %54, %55, %56, %57 in 0 : vector<8x288xf32>, vector<8x288xf32>, vector<8x288xf32>, vector<8x288xf32>, vector<8x288xf32>, vector<8x288xf32>, vector<8x288xf32>, vector<8x288xf32>, vector<8x288xf32> -> vector<72x288xf32>
    %59 = arith.truncf %58 : vector<72x288xf32> to vector<72x288xbf16>
    %cst_19 = arith.constant dense<0.000000e+00> : vector<8x288xf32>
    %60 = tpu.matmul %0, %59, %cst_19 {dimension_numbers = #tpu.dot_dimension_numbers<[1], [0], [0], [1], [0, 0, 1, 1], [], []>} : vector<8x72xbf16>, vector<72x288xbf16>, vector<8x288xf32> -> vector<8x288xf32>
    %61 = vector.broadcast %4 : vector<8x1xf32> to vector<8x288xf32>
    %62 = arith.addf %60, %61 : vector<8x288xf32>
    %cst_20 = arith.constant 0.000000e+00 : f32
    %63 = vector.broadcast %cst_20 : f32 to vector<8x288xf32>
    %64 = arith.maximumf %62, %63 : vector<8x288xf32>
    %65 = vector.extract_strided_slice %64 {offsets = [0, 0], sizes = [8, 268], strides = [1, 1]} : vector<8x288xf32> to vector<8x268xf32>
    %66 = vector.extract_strided_slice %64 {offsets = [0, 18], sizes = [8, 268], strides = [1, 1]} : vector<8x288xf32> to vector<8x268xf32>
    %67 = arith.maximumf %65, %66 : vector<8x268xf32>
    %68 = vector.extract_strided_slice %67 {offsets = [0, 0], sizes = [8, 267], strides = [1, 1]} : vector<8x268xf32> to vector<8x267xf32>
    %69 = vector.extract_strided_slice %67 {offsets = [0, 1], sizes = [8, 267], strides = [1, 1]} : vector<8x268xf32> to vector<8x267xf32>
    %70 = arith.maximumf %68, %69 : vector<8x267xf32>
    %71 = arith.truncf %70 : vector<8x267xf32> to vector<8x267xbf16>
    %cst_21 = arith.constant dense<0.000000e+00> : vector<8x128xf32>
    %72 = tpu.matmul %71, %2, %cst_21 {dimension_numbers = #tpu.dot_dimension_numbers<[1], [0], [0], [1], [0, 0, 1, 1], [], []>} : vector<8x267xbf16>, vector<267x128xbf16>, vector<8x128xf32> -> vector<8x128xf32>
    %73 = vector.extract_strided_slice %72 {offsets = [0, 0], sizes = [8, 80], strides = [1, 1]} : vector<8x128xf32> to vector<8x80xf32>
    %74 = vector.extract_strided_slice %72 {offsets = [0, 1], sizes = [8, 80], strides = [1, 1]} : vector<8x128xf32> to vector<8x80xf32>
    %75 = vector.extract_strided_slice %72 {offsets = [0, 2], sizes = [8, 80], strides = [1, 1]} : vector<8x128xf32> to vector<8x80xf32>
    %76 = vector.extract_strided_slice %72 {offsets = [0, 10], sizes = [8, 80], strides = [1, 1]} : vector<8x128xf32> to vector<8x80xf32>
    %77 = vector.extract_strided_slice %72 {offsets = [0, 11], sizes = [8, 80], strides = [1, 1]} : vector<8x128xf32> to vector<8x80xf32>
    %78 = vector.extract_strided_slice %72 {offsets = [0, 12], sizes = [8, 80], strides = [1, 1]} : vector<8x128xf32> to vector<8x80xf32>
    %79 = vector.extract_strided_slice %72 {offsets = [0, 20], sizes = [8, 80], strides = [1, 1]} : vector<8x128xf32> to vector<8x80xf32>
    %80 = vector.extract_strided_slice %72 {offsets = [0, 21], sizes = [8, 80], strides = [1, 1]} : vector<8x128xf32> to vector<8x80xf32>
    %81 = vector.extract_strided_slice %72 {offsets = [0, 22], sizes = [8, 80], strides = [1, 1]} : vector<8x128xf32> to vector<8x80xf32>
    %82 = tpu.concatenate %73, %74, %75, %76, %77, %78, %79, %80, %81 in 0 : vector<8x80xf32>, vector<8x80xf32>, vector<8x80xf32>, vector<8x80xf32>, vector<8x80xf32>, vector<8x80xf32>, vector<8x80xf32>, vector<8x80xf32>, vector<8x80xf32> -> vector<72x80xf32>
    %83 = arith.truncf %82 : vector<72x80xf32> to vector<72x80xbf16>
    %cst_22 = arith.constant dense<0.000000e+00> : vector<16x80xf32>
    %84 = tpu.matmul %1, %83, %cst_22 {dimension_numbers = #tpu.dot_dimension_numbers<[1], [0], [0], [1], [0, 0, 1, 1], [], []>} : vector<16x72xbf16>, vector<72x80xbf16>, vector<16x80xf32> -> vector<16x80xf32>
    %85 = vector.broadcast %5 : vector<16x1xf32> to vector<16x80xf32>
    %86 = arith.addf %84, %85 : vector<16x80xf32>
    %87 = math.tanh %86 : vector<16x80xf32>
    %c2 = arith.constant 2 : index
    %c0_23 = arith.constant 0 : index
    %c0_24 = arith.constant 0 : index
    %88 = vector.load %arg1[%c2, %c0_23, %c0_24] : memref<4x8x384xf32, #tpu.memory_space<vmem>>, vector<1x8x384xf32>
    %89 = vector.shape_cast %88 : vector<1x8x384xf32> to vector<8x384xf32>
    %90 = vector.extract_strided_slice %89 {offsets = [0, 0], sizes = [8, 288], strides = [1, 1]} : vector<8x384xf32> to vector<8x288xf32>
    %91 = vector.extract_strided_slice %89 {offsets = [0, 1], sizes = [8, 288], strides = [1, 1]} : vector<8x384xf32> to vector<8x288xf32>
    %92 = vector.extract_strided_slice %89 {offsets = [0, 2], sizes = [8, 288], strides = [1, 1]} : vector<8x384xf32> to vector<8x288xf32>
    %93 = vector.extract_strided_slice %89 {offsets = [0, 18], sizes = [8, 288], strides = [1, 1]} : vector<8x384xf32> to vector<8x288xf32>
    %94 = vector.extract_strided_slice %89 {offsets = [0, 19], sizes = [8, 288], strides = [1, 1]} : vector<8x384xf32> to vector<8x288xf32>
    %95 = vector.extract_strided_slice %89 {offsets = [0, 20], sizes = [8, 288], strides = [1, 1]} : vector<8x384xf32> to vector<8x288xf32>
    %96 = vector.extract_strided_slice %89 {offsets = [0, 36], sizes = [8, 288], strides = [1, 1]} : vector<8x384xf32> to vector<8x288xf32>
    %97 = vector.extract_strided_slice %89 {offsets = [0, 37], sizes = [8, 288], strides = [1, 1]} : vector<8x384xf32> to vector<8x288xf32>
    %98 = vector.extract_strided_slice %89 {offsets = [0, 38], sizes = [8, 288], strides = [1, 1]} : vector<8x384xf32> to vector<8x288xf32>
    %99 = tpu.concatenate %90, %91, %92, %93, %94, %95, %96, %97, %98 in 0 : vector<8x288xf32>, vector<8x288xf32>, vector<8x288xf32>, vector<8x288xf32>, vector<8x288xf32>, vector<8x288xf32>, vector<8x288xf32>, vector<8x288xf32>, vector<8x288xf32> -> vector<72x288xf32>
    %100 = arith.truncf %99 : vector<72x288xf32> to vector<72x288xbf16>
    %cst_25 = arith.constant dense<0.000000e+00> : vector<8x288xf32>
    %101 = tpu.matmul %0, %100, %cst_25 {dimension_numbers = #tpu.dot_dimension_numbers<[1], [0], [0], [1], [0, 0, 1, 1], [], []>} : vector<8x72xbf16>, vector<72x288xbf16>, vector<8x288xf32> -> vector<8x288xf32>
    %102 = vector.broadcast %4 : vector<8x1xf32> to vector<8x288xf32>
    %103 = arith.addf %101, %102 : vector<8x288xf32>
    %cst_26 = arith.constant 0.000000e+00 : f32
    %104 = vector.broadcast %cst_26 : f32 to vector<8x288xf32>
    %105 = arith.maximumf %103, %104 : vector<8x288xf32>
    %106 = vector.extract_strided_slice %105 {offsets = [0, 0], sizes = [8, 268], strides = [1, 1]} : vector<8x288xf32> to vector<8x268xf32>
    %107 = vector.extract_strided_slice %105 {offsets = [0, 18], sizes = [8, 268], strides = [1, 1]} : vector<8x288xf32> to vector<8x268xf32>
    %108 = arith.maximumf %106, %107 : vector<8x268xf32>
    %109 = vector.extract_strided_slice %108 {offsets = [0, 0], sizes = [8, 267], strides = [1, 1]} : vector<8x268xf32> to vector<8x267xf32>
    %110 = vector.extract_strided_slice %108 {offsets = [0, 1], sizes = [8, 267], strides = [1, 1]} : vector<8x268xf32> to vector<8x267xf32>
    %111 = arith.maximumf %109, %110 : vector<8x267xf32>
    %112 = arith.truncf %111 : vector<8x267xf32> to vector<8x267xbf16>
    %cst_27 = arith.constant dense<0.000000e+00> : vector<8x128xf32>
    %113 = tpu.matmul %112, %2, %cst_27 {dimension_numbers = #tpu.dot_dimension_numbers<[1], [0], [0], [1], [0, 0, 1, 1], [], []>} : vector<8x267xbf16>, vector<267x128xbf16>, vector<8x128xf32> -> vector<8x128xf32>
    %114 = vector.extract_strided_slice %113 {offsets = [0, 0], sizes = [8, 80], strides = [1, 1]} : vector<8x128xf32> to vector<8x80xf32>
    %115 = vector.extract_strided_slice %113 {offsets = [0, 1], sizes = [8, 80], strides = [1, 1]} : vector<8x128xf32> to vector<8x80xf32>
    %116 = vector.extract_strided_slice %113 {offsets = [0, 2], sizes = [8, 80], strides = [1, 1]} : vector<8x128xf32> to vector<8x80xf32>
    %117 = vector.extract_strided_slice %113 {offsets = [0, 10], sizes = [8, 80], strides = [1, 1]} : vector<8x128xf32> to vector<8x80xf32>
    %118 = vector.extract_strided_slice %113 {offsets = [0, 11], sizes = [8, 80], strides = [1, 1]} : vector<8x128xf32> to vector<8x80xf32>
    %119 = vector.extract_strided_slice %113 {offsets = [0, 12], sizes = [8, 80], strides = [1, 1]} : vector<8x128xf32> to vector<8x80xf32>
    %120 = vector.extract_strided_slice %113 {offsets = [0, 20], sizes = [8, 80], strides = [1, 1]} : vector<8x128xf32> to vector<8x80xf32>
    %121 = vector.extract_strided_slice %113 {offsets = [0, 21], sizes = [8, 80], strides = [1, 1]} : vector<8x128xf32> to vector<8x80xf32>
    %122 = vector.extract_strided_slice %113 {offsets = [0, 22], sizes = [8, 80], strides = [1, 1]} : vector<8x128xf32> to vector<8x80xf32>
    %123 = tpu.concatenate %114, %115, %116, %117, %118, %119, %120, %121, %122 in 0 : vector<8x80xf32>, vector<8x80xf32>, vector<8x80xf32>, vector<8x80xf32>, vector<8x80xf32>, vector<8x80xf32>, vector<8x80xf32>, vector<8x80xf32>, vector<8x80xf32> -> vector<72x80xf32>
    %124 = arith.truncf %123 : vector<72x80xf32> to vector<72x80xbf16>
    %cst_28 = arith.constant dense<0.000000e+00> : vector<16x80xf32>
    %125 = tpu.matmul %1, %124, %cst_28 {dimension_numbers = #tpu.dot_dimension_numbers<[1], [0], [0], [1], [0, 0, 1, 1], [], []>} : vector<16x72xbf16>, vector<72x80xbf16>, vector<16x80xf32> -> vector<16x80xf32>
    %126 = vector.broadcast %5 : vector<16x1xf32> to vector<16x80xf32>
    %127 = arith.addf %125, %126 : vector<16x80xf32>
    %128 = math.tanh %127 : vector<16x80xf32>
    %c3 = arith.constant 3 : index
    %c0_29 = arith.constant 0 : index
    %c0_30 = arith.constant 0 : index
    %129 = vector.load %arg1[%c3, %c0_29, %c0_30] : memref<4x8x384xf32, #tpu.memory_space<vmem>>, vector<1x8x384xf32>
    %130 = vector.shape_cast %129 : vector<1x8x384xf32> to vector<8x384xf32>
    %131 = vector.extract_strided_slice %130 {offsets = [0, 0], sizes = [8, 288], strides = [1, 1]} : vector<8x384xf32> to vector<8x288xf32>
    %132 = vector.extract_strided_slice %130 {offsets = [0, 1], sizes = [8, 288], strides = [1, 1]} : vector<8x384xf32> to vector<8x288xf32>
    %133 = vector.extract_strided_slice %130 {offsets = [0, 2], sizes = [8, 288], strides = [1, 1]} : vector<8x384xf32> to vector<8x288xf32>
    %134 = vector.extract_strided_slice %130 {offsets = [0, 18], sizes = [8, 288], strides = [1, 1]} : vector<8x384xf32> to vector<8x288xf32>
    %135 = vector.extract_strided_slice %130 {offsets = [0, 19], sizes = [8, 288], strides = [1, 1]} : vector<8x384xf32> to vector<8x288xf32>
    %136 = vector.extract_strided_slice %130 {offsets = [0, 20], sizes = [8, 288], strides = [1, 1]} : vector<8x384xf32> to vector<8x288xf32>
    %137 = vector.extract_strided_slice %130 {offsets = [0, 36], sizes = [8, 288], strides = [1, 1]} : vector<8x384xf32> to vector<8x288xf32>
    %138 = vector.extract_strided_slice %130 {offsets = [0, 37], sizes = [8, 288], strides = [1, 1]} : vector<8x384xf32> to vector<8x288xf32>
    %139 = vector.extract_strided_slice %130 {offsets = [0, 38], sizes = [8, 288], strides = [1, 1]} : vector<8x384xf32> to vector<8x288xf32>
    %140 = tpu.concatenate %131, %132, %133, %134, %135, %136, %137, %138, %139 in 0 : vector<8x288xf32>, vector<8x288xf32>, vector<8x288xf32>, vector<8x288xf32>, vector<8x288xf32>, vector<8x288xf32>, vector<8x288xf32>, vector<8x288xf32>, vector<8x288xf32> -> vector<72x288xf32>
    %141 = arith.truncf %140 : vector<72x288xf32> to vector<72x288xbf16>
    %cst_31 = arith.constant dense<0.000000e+00> : vector<8x288xf32>
    %142 = tpu.matmul %0, %141, %cst_31 {dimension_numbers = #tpu.dot_dimension_numbers<[1], [0], [0], [1], [0, 0, 1, 1], [], []>} : vector<8x72xbf16>, vector<72x288xbf16>, vector<8x288xf32> -> vector<8x288xf32>
    %143 = vector.broadcast %4 : vector<8x1xf32> to vector<8x288xf32>
    %144 = arith.addf %142, %143 : vector<8x288xf32>
    %cst_32 = arith.constant 0.000000e+00 : f32
    %145 = vector.broadcast %cst_32 : f32 to vector<8x288xf32>
    %146 = arith.maximumf %144, %145 : vector<8x288xf32>
    %147 = vector.extract_strided_slice %146 {offsets = [0, 0], sizes = [8, 268], strides = [1, 1]} : vector<8x288xf32> to vector<8x268xf32>
    %148 = vector.extract_strided_slice %146 {offsets = [0, 18], sizes = [8, 268], strides = [1, 1]} : vector<8x288xf32> to vector<8x268xf32>
    %149 = arith.maximumf %147, %148 : vector<8x268xf32>
    %150 = vector.extract_strided_slice %149 {offsets = [0, 0], sizes = [8, 267], strides = [1, 1]} : vector<8x268xf32> to vector<8x267xf32>
    %151 = vector.extract_strided_slice %149 {offsets = [0, 1], sizes = [8, 267], strides = [1, 1]} : vector<8x268xf32> to vector<8x267xf32>
    %152 = arith.maximumf %150, %151 : vector<8x267xf32>
    %153 = arith.truncf %152 : vector<8x267xf32> to vector<8x267xbf16>
    %cst_33 = arith.constant dense<0.000000e+00> : vector<8x128xf32>
    %154 = tpu.matmul %153, %2, %cst_33 {dimension_numbers = #tpu.dot_dimension_numbers<[1], [0], [0], [1], [0, 0, 1, 1], [], []>} : vector<8x267xbf16>, vector<267x128xbf16>, vector<8x128xf32> -> vector<8x128xf32>
    %155 = vector.extract_strided_slice %154 {offsets = [0, 0], sizes = [8, 80], strides = [1, 1]} : vector<8x128xf32> to vector<8x80xf32>
    %156 = vector.extract_strided_slice %154 {offsets = [0, 1], sizes = [8, 80], strides = [1, 1]} : vector<8x128xf32> to vector<8x80xf32>
    %157 = vector.extract_strided_slice %154 {offsets = [0, 2], sizes = [8, 80], strides = [1, 1]} : vector<8x128xf32> to vector<8x80xf32>
    %158 = vector.extract_strided_slice %154 {offsets = [0, 10], sizes = [8, 80], strides = [1, 1]} : vector<8x128xf32> to vector<8x80xf32>
    %159 = vector.extract_strided_slice %154 {offsets = [0, 11], sizes = [8, 80], strides = [1, 1]} : vector<8x128xf32> to vector<8x80xf32>
    %160 = vector.extract_strided_slice %154 {offsets = [0, 12], sizes = [8, 80], strides = [1, 1]} : vector<8x128xf32> to vector<8x80xf32>
    %161 = vector.extract_strided_slice %154 {offsets = [0, 20], sizes = [8, 80], strides = [1, 1]} : vector<8x128xf32> to vector<8x80xf32>
    %162 = vector.extract_strided_slice %154 {offsets = [0, 21], sizes = [8, 80], strides = [1, 1]} : vector<8x128xf32> to vector<8x80xf32>
    %163 = vector.extract_strided_slice %154 {offsets = [0, 22], sizes = [8, 80], strides = [1, 1]} : vector<8x128xf32> to vector<8x80xf32>
    %164 = tpu.concatenate %155, %156, %157, %158, %159, %160, %161, %162, %163 in 0 : vector<8x80xf32>, vector<8x80xf32>, vector<8x80xf32>, vector<8x80xf32>, vector<8x80xf32>, vector<8x80xf32>, vector<8x80xf32>, vector<8x80xf32>, vector<8x80xf32> -> vector<72x80xf32>
    %165 = arith.truncf %164 : vector<72x80xf32> to vector<72x80xbf16>
    %cst_34 = arith.constant dense<0.000000e+00> : vector<16x80xf32>
    %166 = tpu.matmul %1, %165, %cst_34 {dimension_numbers = #tpu.dot_dimension_numbers<[1], [0], [0], [1], [0, 0, 1, 1], [], []>} : vector<16x72xbf16>, vector<72x80xbf16>, vector<16x80xf32> -> vector<16x80xf32>
    %167 = vector.broadcast %5 : vector<16x1xf32> to vector<16x80xf32>
    %168 = arith.addf %166, %167 : vector<16x80xf32>
    %169 = math.tanh %168 : vector<16x80xf32>
    %170 = tpu.concatenate %46, %87, %128, %169 in 1 : vector<16x80xf32>, vector<16x80xf32>, vector<16x80xf32>, vector<16x80xf32> -> vector<16x320xf32>
    %171 = arith.truncf %170 : vector<16x320xf32> to vector<16x320xbf16>
    %cst_35 = arith.constant dense<0.000000e+00> : vector<16x128xf32>
    %172 = tpu.matmul %171, %3, %cst_35 {dimension_numbers = #tpu.dot_dimension_numbers<[1], [0], [0], [1], [0, 0, 1, 1], [], []>} : vector<16x320xbf16>, vector<320x128xbf16>, vector<16x128xf32> -> vector<16x128xf32>
    %c0_36 = arith.constant 0 : index
    %c0_37 = arith.constant 0 : index
    %173 = vector.load %arg8[%c0_36, %c0_37] : memref<1x128xf32, #tpu.memory_space<vmem>>, vector<1x128xf32>
    %174 = vector.broadcast %173 : vector<1x128xf32> to vector<16x128xf32>
    %175 = arith.addf %172, %174 : vector<16x128xf32>
    %176 = arith.negf %175 : vector<16x128xf32>
    %177 = math.exp %176 : vector<16x128xf32>
    %cst_38 = arith.constant 1.000000e+00 : f32
    %178 = vector.broadcast %cst_38 : f32 to vector<16x128xf32>
    %179 = arith.addf %178, %177 : vector<16x128xf32>
    %180 = arith.divf %178, %179 : vector<16x128xf32>
    %c0_39 = arith.constant 0 : index
    %c0_40 = arith.constant 0 : index
    %181 = vector.load %arg9[%c0_39, %c0_40] : memref<16x128xf32, #tpu.memory_space<vmem>>, vector<16x128xf32>
    tpu.vector_store %arg9[%c0_39, %c0_40], %180 {strides = array<i32>} : memref<16x128xf32, #tpu.memory_space<vmem>>, vector<16x128xf32>,
    return
  }
  func.func @transform_0(%arg0: i32) -> (i32, i32, i32) {
    %c0_i32 = arith.constant 0 : i32
    %c0_i32_0 = arith.constant 0 : i32
    %c0_i32_1 = arith.constant 0 : i32
    return %arg0, %c0_i32, %c0_i32_0 : i32, i32, i32
  }
  func.func @transform_1(%arg0: i32) -> (i32, i32) {
    %c0_i32 = arith.constant 0 : i32
    %c0_i32_0 = arith.constant 0 : i32
    %c0_i32_1 = arith.constant 0 : i32
    return %c0_i32, %c0_i32_0 : i32, i32
  }
  func.func @transform_2(%arg0: i32) -> (i32, i32) {
    %c0_i32 = arith.constant 0 : i32
    %c0_i32_0 = arith.constant 0 : i32
    %c0_i32_1 = arith.constant 0 : i32
    return %c0_i32, %c0_i32_0 : i32, i32
  }
  func.func @transform_3(%arg0: i32) -> (i32, i32) {
    %c0_i32 = arith.constant 0 : i32
    %c0_i32_0 = arith.constant 0 : i32
    %c0_i32_1 = arith.constant 0 : i32
    return %c0_i32, %c0_i32_0 : i32, i32
  }
  func.func @transform_4(%arg0: i32) -> (i32, i32) {
    %c0_i32 = arith.constant 0 : i32
    %c0_i32_0 = arith.constant 0 : i32
    %c0_i32_1 = arith.constant 0 : i32
    return %c0_i32, %c0_i32_0 : i32, i32
  }
  func.func @transform_5(%arg0: i32) -> (i32, i32) {
    %c0_i32 = arith.constant 0 : i32
    %c0_i32_0 = arith.constant 0 : i32
    %c0_i32_1 = arith.constant 0 : i32
    return %c0_i32, %c0_i32_0 : i32, i32
  }
  func.func @transform_6(%arg0: i32) -> (i32, i32) {
    %c0_i32 = arith.constant 0 : i32
    %c0_i32_0 = arith.constant 0 : i32
    %c0_i32_1 = arith.constant 0 : i32
    return %c0_i32, %c0_i32_0 : i32, i32
  }
  func.func @transform_7(%arg0: i32) -> (i32, i32) {
    %c0_i32 = arith.constant 0 : i32
    %c0_i32_0 = arith.constant 0 : i32
    %c0_i32_1 = arith.constant 0 : i32
    return %c0_i32, %c0_i32_0 : i32, i32
  }
  func.func @transform_8(%arg0: i32) -> (i32, i32) {
    %c0_i32 = arith.constant 0 : i32
    %c0_i32_0 = arith.constant 0 : i32
    return %arg0, %c0_i32 : i32, i32
  }
}

</mosaic_0001>

<bundles_post_ra>
// kernel: tile.8
= control target key start
LH: loop header
LB: loop body
LE: loop exit
PB: predicated region body
PF: predicated region fallthrough
CT: control target
= control target key end

     0   :  { %s28_s0 = inlined_call_operand.vmem [shape: f32[8], index: 0, kind: input, shape index: {}]   ;;  %s29_s1 = inlined_call_operand.vmem [shape: f32[16,8], index: 1, kind: output, shape index: {}]  }
   0x1   :  { %v4_v0 = vld [vmem:[%s28_s0] ss:$0 sm:$0xff] }
   0x2   :  { %5 = vst [vmem:[%s29_s1] sm:$0xff] %v4_v0  ;;  %8 = vst [vmem:[%s29_s1 + $0x8] sm:$0xff] %v4_v0 }

// kernel: tile.9
= control target key start
LH: loop header
LB: loop body
LE: loop exit
PB: predicated region body
PF: predicated region fallthrough
CT: control target
= control target key end

     0   :  { %s133_s10 = smov 120   ;;  %s134_s11 = smov 104   ;;  %vm3_vm0 = vcmask 64512   ;;  %vm9_vm1 = vcmask 1048512   ;;  %vm15_vm2 = vcmask 982912   ;;  %vm21_vm3 = vcmask 917312   ;;  %s209_s0 = inlined_call_operand.vmem [shape: f32[16,8], index: 0, kind: input, shape index: {}]   ;;  %s210_s1 = inlined_call_operand.vmem [shape: f32[1,128], index: 1, kind: output, shape index: {}]  }
   0x1   :  { %v103_v0 = vld [vmem:[%s209_s0 + $0xf] sm:$0x1]   ;;  %v105_v1 = vld [vmem:[%s209_s0 + $0xd] sm:$0x1]   ;;  %v104_v2 = vld [vmem:[%s209_s0 + $0xe] sm:$0x1]  }
   0x2   :  { %7 = vrot.lane.b32.xlu0 %v103_v0, %s133_s10  ;;  %19 = vrot.lane.b32.xlu1 %v105_v1, %s134_s11  ;;  %v106_v3 = vld [vmem:[%s209_s0 + $0xc] sm:$0x1]   ;;  %s135_s16 = smov 112   ;;  %s136_s17 = smov 96   ;;  %v107_v4 = vld [vmem:[%s209_s0 + $0xb] sm:$0x1]  }
   0x3   :  { %v108_v5 = vld [vmem:[%s209_s0 + $0xa] sm:$0x1]   ;;  %v2_v6 = vld [vmem:[%s209_s0] sm:$0x1]   ;;  %s137_s24 = smov 88   ;;  %s138_s25 = smov 80  }
   0x4   :  { %4 = vst.msk [vmem:[#allocation0] sm:$0x1] %vm3_vm0, %v2_v6   ;;  %v109_v7 = vld [vmem:[%s209_s0 + $0x9] sm:$0x1]   ;;  %v110_v8 = vld [vmem:[%s209_s0 + $0x8] sm:$0x1]  }
   0x5   :  { %s139_s30 = smov 72   ;;  %s140_s2 = smov 64   ;;  %v111_v9 = vld [vmem:[%s209_s0 + $0x7] sm:$0x1]   ;;  %v112_v10 = vld [vmem:[%s209_s0 + $0x6] sm:$0x1]  }
   0x6   :  { %13 = vrot.lane.b32.xlu0 %v104_v2, %s135_s16  ;;  %25 = vrot.lane.b32.xlu1 %v106_v3, %s136_s17  ;;  %s141_s7 = smov 56   ;;  %s142_s8 = smov 48   ;;  %v113_v11 = vld [vmem:[%s209_s0 + $0x5] sm:$0x1]   ;;  %v114_v12 = vld [vmem:[%s209_s0 + $0x4] sm:$0x1]  }
   0x7   :  { %s143_s13 = smov 40   ;;  %s144_s14 = smov 32   ;;  %v115_v13 = vld [vmem:[%s209_s0 + $0x3] sm:$0x1]   ;;  %v116_v14 = vld [vmem:[%s209_s0 + $0x2] sm:$0x1]  }
   0x8   :  { %s145_s19 = smov 24   ;;  %s146_s20 = smov 16   ;;  %v117_v15 = vld [vmem:[%s209_s0 + $0x1] sm:$0x1]   ;;  %vm27_vm4 = vcmask 851712   ;;  %vm33_vm5 = vcmask 786112  }
   0x9   :  { %s147_s0 = smov 8   ;;  %vm39_vm6 = vcmask 720512   ;;  %vm45_vm7 = vcmask 654912   ;;  %vm51_vm8 = vcmask 589312   ;;  %vm57_vm9 = vcmask 523712  }
   0xa   :  { %31 = vrot.lane.b32.xlu0 %v107_v4, %s137_s24  ;;  %37 = vrot.lane.b32.xlu1 %v108_v5, %s138_s25  ;;  %vm63_vm10 = vcmask 458112   ;;  %vm69_vm11 = vcmask 392512   ;;  %vm75_vm12 = vcmask 326912   ;;  %vm81_vm13 = vcmask 261312  }
   0xb   :  { %vm87_vm14 = vcmask 195712   ;;  %vm93_vm15 = vcmask 130112  }
   0xe   :  { %43 = vrot.lane.b32.xlu0 %v109_v7, %s139_s30  ;;  %49 = vrot.lane.b32.xlu1 %v110_v8, %s140_s2 }
  0x12   :  { %55 = vrot.lane.b32.xlu0 %v111_v9, %s141_s7  ;;  %61 = vrot.lane.b32.xlu1 %v112_v10, %s142_s8 }
  0x16   :  { %67 = vrot.lane.b32.xlu0 %v113_v11, %s143_s13  ;;  %73 = vrot.lane.b32.xlu1 %v114_v12, %s144_s14 }
  0x1a   :  { %79 = vrot.lane.b32.xlu0 %v115_v13, %s145_s19  ;;  %85 = vrot.lane.b32.xlu1 %v116_v14, %s146_s20 }
  0x1e   :  { %91 = vrot.lane.b32.xlu0 %v117_v15, %s147_s0 }
  0x74   :  { %v8_v16 = vpop.permute.xlu0 %7   ;;  %v20_v17 = vpop.permute.xlu1 %19  }
  0x75   :  { %10 = vst.msk [vmem:[#allocation0] sm:$0x1] %vm9_vm1, %v8_v16  }
  0x78   :  { %v14_v18 = vpop.permute.xlu0 %13   ;;  %v26_v19 = vpop.permute.xlu1 %25  }
  0x79   :  { %16 = vst.msk [vmem:[#allocation0] sm:$0x1] %vm15_vm2, %v14_v18  }
  0x7a   :  { %22 = vst.msk [vmem:[#allocation0] sm:$0x1] %vm21_vm3, %v20_v17  }
  0x7b   :  { %28 = vst.msk [vmem:[#allocation0] sm:$0x1] %vm27_vm4, %v26_v19  }
  0x7c   :  { %v32_v20 = vpop.permute.xlu0 %31   ;;  %v38_v21 = vpop.permute.xlu1 %37  }
  0x7d   :  { %34 = vst.msk [vmem:[#allocation0] sm:$0x1] %vm33_vm5, %v32_v20  }
  0x7e   :  { %40 = vst.msk [vmem:[#allocation0] sm:$0x1] %vm39_vm6, %v38_v21  }
  0x80   :  { %v44_v22 = vpop.permute.xlu0 %43   ;;  %v50_v23 = vpop.permute.xlu1 %49  }
  0x81   :  { %46 = vst.msk [vmem:[#allocation0] sm:$0x1] %vm45_vm7, %v44_v22  }
  0x82   :  { %52 = vst.msk [vmem:[#allocation0] sm:$0x1] %vm51_vm8, %v50_v23  }
  0x84   :  { %v56_v24 = vpop.permute.xlu0 %55   ;;  %v62_v25 = vpop.permute.xlu1 %61  }
  0x85   :  { %58 = vst.msk [vmem:[#allocation0] sm:$0x1] %vm57_vm9, %v56_v24  }
  0x86   :  { %64 = vst.msk [vmem:[#allocation0] sm:$0x1] %vm63_vm10, %v62_v25  }
  0x88   :  { %v68_v26 = vpop.permute.xlu0 %67   ;;  %v74_v27 = vpop.permute.xlu1 %73  }
  0x89   :  { %70 = vst.msk [vmem:[#allocation0] sm:$0x1] %vm69_vm11, %v68_v26  }
  0x8a   :  { %76 = vst.msk [vmem:[#allocation0] sm:$0x1] %vm75_vm12, %v74_v27  }
  0x8c   :  { %v80_v28 = vpop.permute.xlu0 %79   ;;  %v86_v29 = vpop.permute.xlu1 %85  }
  0x8d   :  { %82 = vst.msk [vmem:[#allocation0] sm:$0x1] %vm81_vm13, %v80_v28  }
  0x8e   :  { %88 = vst.msk [vmem:[#allocation0] sm:$0x1] %vm87_vm14, %v86_v29  }
  0x90   :  { %v92_v30 = vpop.permute.xlu0 %91  }
  0x91   :  { %94 = vst.msk [vmem:[#allocation0] sm:$0x1] %vm93_vm15, %v92_v30  }
  0x98   :  { %v99_v31 = vld [vmem:[#allocation0] sm:$0x1] }
  0x99   :  { %102 = vst [vmem:[%s210_s1] sm:$0x1] %v99_v31 }

// kernel: nn_model_forward.1
= control target key start
LH: loop header
LB: loop body
LE: loop exit
PB: predicated region body
PF: predicated region fallthrough
CT: control target
= control target key end

     0   :  { %s3252_s27 = smov 0   ;;  %s4112_s0 = inlined_call_operand.vmem [shape: f32[8,8,384], index: 0, kind: input, shape index: {}]   ;;  %s4113_s1 = inlined_call_operand.vmem [shape: bf16[8,72], index: 1, kind: input, shape index: {}]   ;;  %s4114_s2 = inlined_call_operand.vmem [shape: f32[8,1], index: 2, kind: input, shape index: {}]   ;;  %s4115_s3 = inlined_call_operand.vmem [shape: bf16[267,128], index: 3, kind: input, shape index: {}]   ;;  %s4116_s4 = inlined_call_operand.vmem [shape: bf16[16,72], index: 4, kind: input, shape index: {}]   ;;  %s4117_s5 = inlined_call_operand.vmem [shape: f32[16,1], index: 5, kind: input, shape index: {}]   ;;  %s4118_s6 = inlined_call_operand.vmem [shape: bf16[320,128], index: 6, kind: input, shape index: {}]   ;;  %s4119_s7 = inlined_call_operand.vmem [shape: f32[1,128], index: 7, kind: input, shape index: {}]   ;;  %s4120_s8 = inlined_call_operand.vmem [shape: f32[32,128], index: 8, kind: output, shape index: {}]  }
   0x1 LB: > { %s2452_s28 = sadd.s32 4294967295, %s3185_s27   ;;  %p2456_p0 = scmp.ge.s32.totalorder %s3185_s27, 1  ;;  %s3185_s27 = sphi %s3252_s27, %s18_s27  }
   0x2   : > { %p264_p1 = scmp.lt.s32.totalorder %s3185_s27, 3 }
   0x4   : > { %p265_p2 = pnand %p2456_p0, %p264_p1 }
   0x5   : > { %s2457_s29 = sshll.u32 (!%p265_p2), %s2452_s28, 2  ;;  %s3188_s12 = smov (!%p265_p2), 92  }
   0x6   : > { %268 = sbr.rel (%p265_p2) target bundleno = 3945 (0xf69), region = 52  ;;  %p300_p3 = scmp.lt.s32.totalorder (!%p265_p2), %s2457_s29, 7 }
   0x7   : > { %s3189_s13 = smov (!%p265_p2), 90   ;;  %s3190_s14 = smov (!%p265_p2), 91  }
   0x8   : > { %s3191_s15 = smov (!%p265_p2), 108   ;;  %s3192_s16 = smov (!%p265_p2), 109  }
   0x9   : > { %s3193_s17 = smov (!%p265_p2), 110   ;;  %s3194_s18 = smov (!%p265_p2), 126  }
   0xa   : > { %s3197_s19 = smov (!%p265_p2), 127   ;;  %s3199_s25 = smov (!%p265_p2), 106  }
   0xb   : > { %s4122_s29 = smov (!%p300_p3, %s2457_s29), 7  ;;  %v3187_v0 = vmov 0.0   ;;  %vm3195_vm0 = vmmov 0   ;;  %v3196_v6 = vmov 0   ;;  %v390_v7 = vld [vmem:[%s4114_s2] sm:$0xff]  ;;  %vm465_vm1 = vcmask 752640  }
   0xc   : > { %2705 = vmatprep.subr.bf16.mxu1 %v3187_v0  ;;  %s2853_s30 = smul.u32 24, %s4122_s29  ;;  %2715 = vmatprep.mubr.msk.bf16.mxu1 %vm3195_vm0, %v3187_v0  ;;  %vm489_vm2 = vcmask 736256   ;;  %vm477_vm3 = vcmask 744448   ;;  %vm519_vm4 = vcmask 1043456   ;;  %vm453_vm5 = vcmask 883712   ;;  %s3200_s26 = smov 117  }
   0xd   : > { %561 = vmatprep.mubr.bf16.mxu0 %v3196_v6  ;;  %2922 = vset.pattern.permute.xlu0 %v3196_v6  ;;  %vm441_vm6 = vcmask 891904   ;;  %vm429_vm7 = vcmask 900096   ;;  %vm417_vm8 = vcmask 1031168   ;;  %vm405_vm9 = vcmask 1039360   ;;  %s3201_s29 = smov 107   ;;  %s3203_s9 = smov 118  }
   0xe   : > { %s3266_s11 = scalar_lea.vmem %s4112_s0, %s2853_s30  ;;  %3083 = vset.pattern.permute.xlu1 %v3196_v6  ;;  %vm515_vm10 = vcmask 588800   ;;  %vm755_vm11 = vcmask 1044480   ;;  %vm756_vm12 = vcmask 1045504   ;;  %vm751_vm13 = vcmask 89088   ;;  %s3202_s30 = smov 116  }
   0xf   : > { %v3269_v1 = vld [vmem:[%s3266_s11 + $0x8] sm:$0xff]  ;;  %v3272_v2 = vld [vmem:[%s3266_s11 + $0x10] sm:$0xff]  ;;  %v3275_v3 = vld [vmem:[%s3266_s11] sm:$0xff]  ;;  %vm2157_vm14 = vcmask 654336   ;;  %vm2160_vm15 = vcmask 261120  }
  0x10   : > { %v2887_v4 = vpack.i.bf16 %v3272_v2, %v3269_v1  ;;  %v2882_v5 = vpack.i.bf16 %v3269_v1, %v3275_v3 }
  0x12   : > { %2888 = vrot.lane.b32.xlu1 %v2887_v4, %s3188_s12  ;;  %2883 = vrot.lane.b32.xlu0 %v2882_v5, %s3189_s13 }
  0x16   : > { %2893 = vrot.lane.b32.xlu1 %v2887_v4, %s3190_s14  ;;  %487 = vrot.lane.b32.xlu0 %v3272_v2, %s3189_s13 }
  0x1a   : > { %471 = vrot.lane.b32.xlu1 %v3275_v3, %s3190_s14  ;;  %459 = vrot.lane.b32.xlu0 %v3275_v3, %s3188_s12 }
  0x1e   : > { %2903 = vrot.lane.b32.xlu1 %v2887_v4, %s3191_s15  ;;  %2898 = vrot.lane.b32.xlu0 %v2887_v4, %s3192_s16 }
  0x22   : > { %447 = vrot.lane.b32.xlu1 %v3275_v3, %s3191_s15  ;;  %435 = vrot.lane.b32.xlu0 %v3275_v3, %s3192_s16 }
  0x26   : > { %2913 = vrot.lane.b32.xlu1 %v2887_v4, %s3193_s17  ;;  %2908 = vrot.lane.b32.xlu0 %v2887_v4, %s3194_s18 }
  0x2a   : > { %423 = vrot.lane.b32.xlu1 %v3275_v3, %s3193_s17  ;;  %411 = vrot.lane.b32.xlu0 %v3275_v3, %s3194_s18 }
  0x2e   : > { %2918 = vrot.lane.b32.xlu0 %v2887_v4, %s3197_s19  ;;  %399 = vrot.lane.b32.xlu1 %v3275_v3, %s3197_s19 }
  0x32   : > { %512 = vperm.xlu0 %2922, %v390_v7  }
  0x84   : > { %v2889_v8 = vpop.permute.xlu1 %2888  ;;  %v2884_v9 = vpop.permute.xlu0 %2883 }
  0x85   : > { %v2891_v10 = vunpack.i.h.bf16 %v2889_v8  ;;  %v2890_v11 = vunpack.i.l.bf16 %v2889_v8  ;;  %v2886_v12 = vunpack.i.h.bf16 %v2884_v9  ;;  %v2885_v13 = vunpack.i.l.bf16 %v2884_v9 }
  0x87   : > { %v490_v14 = vsel %vm489_vm2, %v2885_v13, %v2886_v12  ;;  %v467_v18 = vsel %vm465_vm1, %v2890_v11, %v2891_v10 }
  0x88   : > { %v2894_v15 = vpop.permute.xlu1 %2893  ;;  %v488_v16 = vpop.permute.xlu0 %487  ;;  %v507_v17 = vpack.c.bf16 %v490_v14, %v490_v14  ;;  %v3342_v14 = vld [vmem:[%s4113_s1] sm:$0xf] }
  0x89   : > { %v2896_v19 = vunpack.i.h.bf16 %v2894_v15  ;;  %v2895_v20 = vunpack.i.l.bf16 %v2894_v15  ;;  %v509_v21 = vpack.c.bf16 %v488_v16, %v488_v16  ;;  %v491_v22 = vsel %vm489_vm2, %v2886_v12, %v488_v16 }
  0x8a   : > { %v508_v23 = vpack.c.bf16 %v491_v22, %v491_v22  ;;  %v521_v28 = vsel %vm519_vm4, %v507_v17, 0  ;;  %v3363_v22 = vld [vmem:[%s4115_s3 + $0x38] sm:$0xff]  }
  0x8b   : > { %v527_v24 = vsel %vm519_vm4, %v509_v21, 0  ;;  %v479_v25 = vsel %vm477_vm3, %v2895_v20, %v2896_v19  ;;  %v506_v33 = vpack.c.bf16 %v2896_v19, %v2891_v10  ;;  %v3358_v21 = vld [vmem:[%s4115_s3 + $0x78] sm:$0xff]  }
  0x8c   : > { %v472_v26 = vpop.permute.xlu1 %471  ;;  %2706 = vmatpush3.bf16.msra.mxu1 %v527_v24  ;;  %v460_v27 = vpop.permute.xlu0 %459  ;;  %2461 = vmatprep.subr.msk.bf16.mxu0 %vm519_vm4, %v508_v23  ;;  %v505_v29 = vpack.c.bf16 %v479_v25, %v467_v18  ;;  %v3368_v23 = vld [vmem:[%s4115_s3 + $0x70] sm:$0xff]  }
  0x8d   : > { %v478_v30 = vsel %vm477_vm3, %v472_v26, %v2895_v20  ;;  %v466_v31 = vsel %vm465_vm1, %v460_v27, %v2890_v11  ;;  %536 = vmatpush1.bf16.msra.mxu0 %v521_v28  ;;  %2707 = vmatprep.subr.bf16.mxu1 %v3187_v0  ;;  %v3375_v28 = vld [vmem:[%s4115_s3 + $0x30] sm:$0xff]  }
  0x8e   : > { %v504_v32 = vpack.c.bf16 %v478_v30, %v466_v31  ;;  %537 = vmatprep.subr.bf16.mxu0 %v505_v29  ;;  %v3382_v31 = vld [vmem:[%s4115_s3 + $0x68] sm:$0xff]  }
  0x90   : > { %v2904_v34 = vpop.permute.xlu1 %2903  ;;  %2708 = vmatpush3.bf16.msra.mxu1 %v506_v33  ;;  %v2899_v35 = vpop.permute.xlu0 %2898 }
  0x91   : > { %v2906_v36 = vunpack.i.h.bf16 %v2904_v34  ;;  %v2905_v37 = vunpack.i.l.bf16 %v2904_v34  ;;  %v2901_v38 = vunpack.i.h.bf16 %v2899_v35  ;;  %v2900_v39 = vunpack.i.l.bf16 %v2899_v35  ;;  %538 = vmatpush1.bf16.msra.mxu0 %v504_v32  ;;  %2709 = vmatprep.subr.bf16.mxu1 %v3187_v0  ;;  %v3389_v32 = vld [vmem:[%s4115_s3 + $0x28] sm:$0xff]   ;;  %v3395_v34 = vld [vmem:[%s4115_s3 + $0x60] sm:$0xff]  }
  0x92   : > { %v3402_v35 = vld [vmem:[%s4115_s3 + $0x20] sm:$0xff]  }
  0x93   : > { %v503_v40 = vpack.c.bf16 %v2906_v36, %v2901_v38  ;;  %v443_v41 = vsel %vm441_vm6, %v2900_v39, %v2901_v38  ;;  %v455_v42 = vsel %vm453_vm5, %v2905_v37, %v2906_v36  ;;  %v3408_v36 = vld [vmem:[%s4115_s3 + $0x58] sm:$0xff]   ;;  %v3420_v38 = vld [vmem:[%s4115_s3 + $0x50] sm:$0xff]  }
  0x94   : > { %v448_v43 = vpop.permute.xlu1 %447  ;;  %v436_v44 = vpop.permute.xlu0 %435  ;;  %v502_v45 = vpack.c.bf16 %v455_v42, %v443_v41  ;;  %v3438_v41 = vld [vmem:[%s4115_s3 + $0x8] sm:$0xff]   ;;  %v3113_v42 = vld [vmem:[%s4115_s3 + $0x80] sm:$0x3f]  }
  0x95   : > { %v454_v46 = vsel %vm453_vm5, %v448_v43, %v2905_v37  ;;  %v442_v47 = vsel %vm441_vm6, %v436_v44, %v2900_v39  ;;  %2710 = vmatpush3.bf16.msra.mxu1 %v503_v40  ;;  %v3414_v37 = vld [vmem:[%s4115_s3 + $0x18] sm:$0xff]   ;;  %v3426_v39 = vld [vmem:[%s4115_s3 + $0x10] sm:$0xff]   ;;  %v3433_v40 = vld [vmem:[%s4115_s3 + $0x48] sm:$0xff]   ;;  %v3198_v43 = vmov 65535  }
  0x96   : > { %v501_v48 = vpack.c.bf16 %v454_v46, %v442_v47  ;;  %539 = vmatprep.subr.bf16.mxu0 %v502_v45  ;;  %2711 = vmatprep.subr.bf16.mxu1 %v3187_v0  ;;  %v757_v44 = vsel %vm755_vm11, 4294967295, %v3198_v43  ;;  %v3450_v47 = vld [vmem:[%s4115_s3 + $0x40] sm:$0xff]  }
  0x97   : > { %v758_v45 = vsel %vm756_vm12, %v757_v44, 0 }
  0x98   : > { %v2914_v49 = vpop.permute.xlu1 %2913  ;;  %v2909_v50 = vpop.permute.xlu0 %2908  ;;  %540 = vmatpush1.bf16.msra.mxu0 %v501_v48  ;;  %v3445_v46 = vand.u32 %v3113_v42, %v758_v45  ;;  %v3456_v48 = vld [vmem:[%s4115_s3] sm:$0xff]  }
  0x99   : > { %v2916_v51 = vunpack.i.h.bf16 %v2914_v49  ;;  %v2915_v52 = vunpack.i.l.bf16 %v2914_v49  ;;  %v2911_v53 = vunpack.i.h.bf16 %v2909_v50  ;;  %v2910_v54 = vunpack.i.l.bf16 %v2909_v50 }
  0x9b   : > { %v500_v55 = vpack.c.bf16 %v2916_v51, %v2911_v53  ;;  %v419_v56 = vsel %vm417_vm8, %v2910_v54, %v2911_v53  ;;  %v431_v57 = vsel %vm429_vm7, %v2915_v52, %v2916_v51 }
  0x9c   : > { %v424_v58 = vpop.permute.xlu1 %423  ;;  %v412_v59 = vpop.permute.xlu0 %411  ;;  %v499_v60 = vpack.c.bf16 %v431_v57, %v419_v56 }
  0x9d   : > { %v430_v61 = vsel %vm429_vm7, %v424_v58, %v2915_v52  ;;  %v418_v62 = vsel %vm417_vm8, %v412_v59, %v2910_v54  ;;  %2712 = vmatpush3.bf16.msra.mxu1 %v500_v55 }
  0x9e   : > { %v498_v63 = vpack.c.bf16 %v430_v61, %v418_v62  ;;  %541 = vmatprep.subr.bf16.mxu0 %v499_v60  ;;  %2713 = vmatprep.subr.bf16.mxu1 %v3187_v0 }
  0xa0   : > { %v2919_v4 = vpop.permute.xlu0 %2918  ;;  %542 = vmatpush1.bf16.msra.mxu0 %v498_v63  ;;  %v400_v5 = vpop.permute.xlu1 %399 }
  0xa1   : > { %v2921_v7 = vunpack.i.h.bf16 %v2919_v4  ;;  %v2920_v8 = vunpack.i.l.bf16 %v2919_v4 }
  0xa3   : > { %v406_v9 = vsel %vm405_vm9, %v400_v5, %v2920_v8  ;;  %v497_v10 = vpack.c.bf16 %v2921_v7, %v3272_v2  ;;  %v407_v11 = vsel %vm405_vm9, %v2920_v8, %v2921_v7 }
  0xa4   : > { %v495_v12 = vpack.c.bf16 %v406_v9, %v3275_v3  ;;  %v496_v13 = vpack.c.bf16 %v407_v11, %v3269_v1 }
  0xa5   : > { %2714 = vmatpush3.bf16.msra.mxu1 %v497_v10 }
  0xa6   : > { %543 = vmatprep.subr.bf16.mxu0 %v496_v13  ;;  %2719 = vmatprep.subr.bf16.mxu1 %v3187_v0  ;;  %v3477_v13 = vld [vmem:[%s3266_s11 + $0x20] sm:$0xff] }
  0xa7   : > { %544 = vmatpush1.bf16.msra.mxu0 %v495_v12  ;;  %v3474_v12 = vld [vmem:[%s3266_s11 + $0x18] sm:$0xff] }
  0xa8   : > { %2716 = vmatmul.mubr.msk.bf16.vlgmr.msra.gmra.mxu1 %vm515_vm10, %v3342_v14  ;;  %2540 = vmatprep.subr.bf16.mxu0 %v3358_v21 }
  0xa9   : > { %2721 = vmatprep.mubr.msk.bf16.mxu1 %vm3195_vm0, %v3187_v0  ;;  %2720 = vmatpush3.bf16.msra.mxu1 %v3445_v46 }
  0xaa   : > { %2462 = vmatmul.mubr.msk.bf16.vlgmr.msra.gmra.mxu0 %vm515_vm10, %v3342_v14  ;;  %2725 = vmatprep.subr.bf16.mxu1 %v3187_v0 }
  0xab   : > { %2541 = vmatpush3.bf16.msra.mxu0 %v3363_v22 }
  0xac   : > { %2542 = vmatprep.subr.bf16.mxu0 %v3368_v23 }
  0xad   : > { %v3351_v2 = vpop.permute.xlu0 %512 }
  0xaf   : > { %2543 = vmatpush3.bf16.msra.mxu0 %v3375_v28 }
  0xb0   : > { %2544 = vmatprep.subr.bf16.mxu0 %v3382_v31 }
  0xb3   : > { %2545 = vmatpush3.bf16.msra.mxu0 %v3389_v32 }
  0xb4   : > { %2546 = vmatprep.subr.bf16.mxu0 %v3395_v34 }
  0xb7   : > { %2547 = vmatpush3.bf16.msra.mxu0 %v3402_v35 }
  0xb8   : > { %2548 = vmatprep.subr.bf16.mxu0 %v3408_v36 }
  0xbb   : > { %2549 = vmatpush3.bf16.msra.mxu0 %v3414_v37 }
  0xbc   : > { %2550 = vmatprep.subr.bf16.mxu0 %v3420_v38 }
  0xbf   : > { %2551 = vmatpush3.bf16.msra.mxu0 %v3426_v39 }
  0xc0   : > { %2552 = vmatprep.subr.bf16.mxu0 %v3433_v40 }
  0xc3   : > { %2553 = vmatpush3.bf16.msra.mxu0 %v3438_v41 }
  0xc4   : > { %2554 = vmatprep.subr.bf16.mxu0 %v3450_v47 }
  0xc7   : > { %2555 = vmatpush3.bf16.msra.mxu0 %v3456_v48 }
  0xc8   : > { %2739 = vmatprep.subr.bf16.mxu0 %v3187_v0 }
 0x168   : > { %v604_v1 = vpop.f32.mrf.mxu1 }
 0x169   : > { %v605_v3 = vadd.f32 %v604_v1, %v3351_v2  ;;  %v2933_v1 = vpack.i.bf16 %v3477_v13, %v3474_v12 }
 0x16a   : > { %v563_v15 = vpop.f32.mrf.mxu0  ;;  %v2717_v16 = vpop.f32.mrf.mxu1 }
 0x16b   : > { %v612_v20 = vmax.f32 %v605_v3, 0.0  ;;  %v564_v29 = vadd.f32 %v563_v15, %v3351_v2  ;;  %v3482_v3 = vld [vmem:[%s3266_s11 + $0x28] sm:$0xff] }
 0x16c   : > { %v565_v17 = vpop.f32.mrf.mxu0  ;;  %v607_v18 = vpop.f32.mrf.mxu1  ;;  %v2938_v15 = vpack.i.bf16 %v3482_v3, %v3477_v13 }
 0x16d   : > { %v566_v19 = vadd.f32 %v565_v17, %v3351_v2  ;;  %v610_v33 = vmax.f32 %v564_v29, 0.0 }
 0x16e   : > { %v567_v24 = vpop.f32.mrf.mxu0  ;;  %v2718_v25 = vpop.f32.mrf.mxu1 }
 0x16f   : > { %v611_v26 = vmax.f32 %v566_v19, 0.0 }
 0x170   : > { %v568_v27 = vpop.f32.mrf.mxu0 }
 0x171   : > { %v2923_v30 = vpack.i.bf16 %v612_v20, %v611_v26 }
 0x173   : > { %2924 = vrot.lane.b32.xlu1 %v2923_v30, %s3193_s17 }
 0x177   : > { %616 = vrot.lane.b32.xlu1 %v610_v33, %s3193_s17 }
 0x1e5   : > { %v2925_v49 = vpop.permute.xlu1 %2924 }
 0x1e6   : > { %v2927_v50 = vunpack.i.h.bf16 %v2925_v49  ;;  %v2926_v51 = vunpack.i.l.bf16 %v2925_v49 }
 0x1e8   : > { %v629_v52 = vmax.f32 %v612_v20, %v2927_v50  ;;  %v623_v53 = vsel %vm429_vm7, %v2926_v51, %v2927_v50 }
 0x1e9   : > { %v617_v54 = vpop.permute.xlu1 %616  ;;  %v628_v55 = vmax.f32 %v611_v26, %v623_v53 }
 0x1ea   : > { %v622_v56 = vsel %vm429_vm7, %v617_v54, %v2926_v51 }
 0x1eb   : > { %v627_v57 = vmax.f32 %v610_v33, %v622_v56  ;;  %v2928_v58 = vpack.i.bf16 %v629_v52, %v628_v55 }
 0x1ed   : > { %2929 = vrot.lane.b32.xlu0 %v2928_v58, %s3197_s19  ;;  %633 = vrot.lane.b32.xlu1 %v627_v57, %s3197_s19 }
 0x1f1   : > { %2934 = vrot.lane.b32.xlu0 %v2933_v1, %s3189_s13  ;;  %1024 = vrot.lane.b32.xlu1 %v3482_v3, %s3189_s13 }
 0x1f5   : > { %2939 = vrot.lane.b32.xlu0 %v2938_v15, %s3188_s12  ;;  %2944 = vrot.lane.b32.xlu1 %v2938_v15, %s3190_s14 }
 0x25f   : > { %v2930_v59 = vpop.permute.xlu0 %2929  ;;  %v634_v62 = vpop.permute.xlu1 %633 }
 0x260   : > { %v2932_v60 = vunpack.i.h.bf16 %v2930_v59  ;;  %v2931_v61 = vunpack.i.l.bf16 %v2930_v59 }
 0x262   : > { %v646_v63 = vmax.f32 %v629_v52, %v2932_v60  ;;  %v639_v4 = vsel %vm405_vm9, %v634_v62, %v2931_v61  ;;  %v640_v5 = vsel %vm405_vm9, %v2931_v61, %v2932_v60 }
 0x263   : > { %v644_v7 = vmax.f32 %v627_v57, %v639_v4  ;;  %v645_v8 = vmax.f32 %v628_v55, %v640_v5  ;;  %v3491_v16 = vpop.permute.xlu0 %2934  ;;  %v1025_v17 = vpop.permute.xlu1 %1024 }
 0x264   : > { %v649_v9 = vpack.c.bf16 %v646_v63, %v646_v63  ;;  %v2937_v18 = vunpack.i.h.bf16 %v3491_v16  ;;  %v1045_v19 = vpack.c.bf16 %v1025_v17, %v1025_v17 }
 0x265   : > { %v647_v10 = vpack.c.bf16 %v644_v7, %v644_v7  ;;  %v648_v11 = vpack.c.bf16 %v645_v8, %v645_v8 }
 0x266   : > { %2722 = vmatmul.mubr.msk.bf16.vlgmr.msra.gmra.mxu1 %vm751_vm13, %v649_v9  ;;  %v3497_v20 = vsel %vm489_vm2, %v2937_v18, %v1025_v17  ;;  %v1053_v24 = vsel %vm519_vm4, %v1045_v19, 0 }
 0x267   : > { %794 = vmatprep.mubr.bf16.mxu0 %v648_v11  ;;  %2735 = vmatprep.mubr.msk.bf16.mxu1 %vm3195_vm0, %v3187_v0  ;;  %v3500_v25 = vpop.permute.xlu0 %2939  ;;  %v3502_v26 = vpop.permute.xlu1 %2944 }
 0x268   : > { %795 = vmatmul.mubr.bf16.vlgmr.msra.gmra.mxu0 %v647_v10  ;;  %v2942_v27 = vunpack.i.h.bf16 %v3500_v25  ;;  %v2941_v29 = vunpack.i.l.bf16 %v3500_v25  ;;  %v2947_v30 = vunpack.i.h.bf16 %v3502_v26  ;;  %v2946_v33 = vunpack.i.l.bf16 %v3502_v26 }
 0x269   : > { %2749 = vmatprep.mubr.msk.bf16.mxu0 %vm3195_vm0, %v3187_v0  ;;  %2740 = vmatpush3.bf16.msra.mxu0 %v1053_v24  ;;  %v2936_v10 = vunpack.i.l.bf16 %v3491_v16 }
 0x26a   : > { %2741 = vmatprep.subr.bf16.mxu0 %v3187_v0  ;;  %v1042_v42 = vpack.c.bf16 %v2947_v30, %v2942_v27  ;;  %v3512_v43 = vsel %vm465_vm1, %v2941_v29, %v2942_v27  ;;  %v3517_v44 = vsel %vm477_vm3, %v2946_v33, %v2947_v30  ;;  %v1044_v30 = vpack.c.bf16 %v3497_v20, %v3497_v20 }
 0x26b   : > { %v1041_v45 = vpack.c.bf16 %v3517_v44, %v3512_v43  ;;  %v1026_v24 = vsel %vm489_vm2, %v2936_v10, %v2937_v18 }
 0x26d   : > { %2742 = vmatpush3.bf16.msra.mxu0 %v1042_v42  ;;  %v3563_v42 = vld [vmem:[%s4116_s4] sm:$0xff]  }
 0x26e   : > { %2743 = vmatprep.subr.bf16.mxu0 %v3187_v0 }
 0x326   : > { %v836_v49 = vpop.f32.mrf.mxu1 }
 0x328   : > { %v2556_v50 = vpop.f32.mrf.mxu0  ;;  %v2723_v51 = vpop.f32.mrf.mxu1 }
 0x32a   : > { %v2557_v52 = vpop.f32.mrf.mxu0  ;;  %v839_v53 = vpop.f32.mrf.mxu1 }
 0x32b   : > { %v2558_v54 = vadd.f32 %v2557_v52, %v2556_v50 }
 0x32c   : > { %v2559_v55 = vpop.f32.mrf.mxu0  ;;  %v2724_v56 = vpop.f32.mrf.mxu1 }
 0x32d   : > { %v837_v57 = vadd.f32 %v2558_v54, %v836_v49  ;;  %v1043_v49 = vpack.c.bf16 %v1026_v24, %v1026_v24 }
 0x32e   : > { %v2560_v58 = vpop.f32.mrf.mxu0 }
 0x32f   : > { %858 = vrot.lane.b32.xlu1 %v837_v57, %s3191_s15  ;;  %864 = vrot.lane.b32.xlu0 %v837_v57, %s3199_s25  ;;  %v1047_v55 = vsel %vm519_vm4, %v1043_v49, 0 }
 0x333   : > { %852 = vrot.lane.b32.xlu1 %v837_v57, %s3200_s26  ;;  %861 = vrot.lane.b32.xlu0 %v837_v57, %s3201_s29 }
 0x337   : > { %846 = vrot.lane.b32.xlu1 %v837_v57, %s3194_s18  ;;  %855 = vrot.lane.b32.xlu0 %v837_v57, %s3202_s30 }
 0x33b   : > { %1009 = vrot.lane.b32.xlu1 %v3474_v12, %s3190_s14  ;;  %849 = vrot.lane.b32.xlu0 %v837_v57, %s3203_s9 }
 0x33f   : > { %843 = vrot.lane.b32.xlu1 %v837_v57, %s3197_s19  ;;  %998 = vrot.lane.b32.xlu0 %v3474_v12, %s3188_s12 }
 0x343   : > { %2954 = vrot.lane.b32.xlu1 %v2938_v15, %s3191_s15  ;;  %2949 = vrot.lane.b32.xlu0 %v2938_v15, %s3192_s16 }
 0x347   : > { %987 = vrot.lane.b32.xlu1 %v3474_v12, %s3191_s15  ;;  %976 = vrot.lane.b32.xlu0 %v3474_v12, %s3192_s16 }
 0x34b   : > { %2964 = vrot.lane.b32.xlu1 %v2938_v15, %s3193_s17  ;;  %2959 = vrot.lane.b32.xlu0 %v2938_v15, %s3194_s18 }
 0x34f   : > { %965 = vrot.lane.b32.xlu1 %v3474_v12, %s3193_s17  ;;  %954 = vrot.lane.b32.xlu0 %v3474_v12, %s3194_s18 }
 0x353   : > { %2969 = vrot.lane.b32.xlu0 %v2938_v15, %s3197_s19  ;;  %943 = vrot.lane.b32.xlu1 %v3474_v12, %s3197_s19 }
 0x3a1   : > { %v865_v59 = vpop.permute.xlu0 %864  ;;  %v859_v60 = vpop.permute.xlu1 %858 }
 0x3a2   : > { %v871_v61 = vpack.c.bf16 %v865_v59, %v865_v59 }
 0x3a4   : > { %v891_v62 = vsel %vm519_vm4, %v871_v61, 0 }
 0x3a5   : > { %2726 = vmatpush3.bf16.msra.mxu1 %v891_v62  ;;  %v862_v63 = vpop.permute.xlu0 %861  ;;  %v853_v4 = vpop.permute.xlu1 %852 }
 0x3a6   : > { %v870_v5 = vpack.c.bf16 %v862_v63, %v859_v60  ;;  %2727 = vmatprep.subr.bf16.mxu1 %v3187_v0 }
 0x3a9   : > { %v856_v7 = vpop.permute.xlu0 %855  ;;  %2728 = vmatpush3.bf16.msra.mxu1 %v870_v5  ;;  %v847_v8 = vpop.permute.xlu1 %846 }
 0x3aa   : > { %v869_v9 = vpack.c.bf16 %v856_v7, %v853_v4  ;;  %2729 = vmatprep.subr.bf16.mxu1 %v3187_v0 }
 0x3ad   : > { %v850_v11 = vpop.permute.xlu0 %849  ;;  %2730 = vmatpush3.bf16.msra.mxu1 %v869_v9  ;;  %v1010_v1 = vpop.permute.xlu1 %1009 }
 0x3ae   : > { %v868_v15 = vpack.c.bf16 %v850_v11, %v847_v8  ;;  %2731 = vmatprep.subr.bf16.mxu1 %v3187_v0  ;;  %v1015_v25 = vsel %vm477_vm3, %v1010_v1, %v2946_v33 }
 0x3b1   : > { %v999_v17 = vpop.permute.xlu0 %998  ;;  %2732 = vmatpush3.bf16.msra.mxu1 %v868_v15  ;;  %v844_v19 = vpop.permute.xlu1 %843 }
 0x3b2   : > { %v867_v27 = vpack.c.bf16 %v844_v19, %v837_v57  ;;  %2733 = vmatprep.subr.bf16.mxu1 %v3187_v0  ;;  %v1004_v18 = vsel %vm465_vm1, %v999_v17, %v2941_v29 }
 0x3b3   : > { %v1040_v29 = vpack.c.bf16 %v1015_v25, %v1004_v18 }
 0x3b5   : > { %v2950_v50 = vpop.permute.xlu0 %2949  ;;  %2734 = vmatpush3.bf16.msra.mxu1 %v867_v27  ;;  %v2955_v51 = vpop.permute.xlu1 %2954 }
 0x3b6   : > { %v2952_v52 = vunpack.i.h.bf16 %v2950_v50  ;;  %v2951_v53 = vunpack.i.l.bf16 %v2950_v50  ;;  %v2957_v16 = vunpack.i.h.bf16 %v2955_v51  ;;  %v2956_v54 = vunpack.i.l.bf16 %v2955_v51  ;;  %2487 = vmatprep.subr.msk.bf16.mxu1 %vm519_vm4, %v1044_v30 }
 0x3b8   : > { %v1039_v20 = vpack.c.bf16 %v2957_v16, %v2952_v52  ;;  %2736 = vmatmul.mubr.msk.bf16.vlgmr.msra.gmra.mxu1 %vm515_vm10, %v3563_v42  ;;  %v983_v58 = vsel %vm441_vm6, %v2951_v53, %v2952_v52  ;;  %v994_v59 = vsel %vm453_vm5, %v2956_v54, %v2957_v16 }
 0x3b9   : > { %v977_v56 = vpop.permute.xlu0 %976  ;;  %1062 = vmatpush1.bf16.msra.mxu1 %v1047_v55  ;;  %v988_v57 = vpop.permute.xlu1 %987  ;;  %1087 = vmatprep.mubr.bf16.mxu1 %v3196_v6  ;;  %v1038_v62 = vpack.c.bf16 %v994_v59, %v983_v58 }
 0x3ba   : > { %1063 = vmatprep.subr.bf16.mxu1 %v1041_v45  ;;  %2744 = vmatpush3.bf16.msra.mxu0 %v1039_v20  ;;  %v982_v60 = vsel %vm441_vm6, %v977_v56, %v2951_v53  ;;  %v993_v61 = vsel %vm453_vm5, %v988_v57, %v2956_v54 }
 0x3bb   : > { %2745 = vmatprep.subr.bf16.mxu0 %v3187_v0  ;;  %v1037_v8 = vpack.c.bf16 %v993_v61, %v982_v60 }
 0x3bd   : > { %v2960_v63 = vpop.permute.xlu0 %2959  ;;  %v2965_v4 = vpop.permute.xlu1 %2964  ;;  %1064 = vmatpush1.bf16.msra.mxu1 %v1040_v29 }
 0x3be   : > { %v2962_v5 = vunpack.i.h.bf16 %v2960_v63  ;;  %v2961_v26 = vunpack.i.l.bf16 %v2960_v63  ;;  %v2967_v7 = vunpack.i.h.bf16 %v2965_v4  ;;  %v2966_v33 = vunpack.i.l.bf16 %v2965_v4  ;;  %1065 = vmatprep.subr.bf16.mxu1 %v1038_v62 }
 0x3c0   : > { %v1036_v43 = vpack.c.bf16 %v2967_v7, %v2962_v5  ;;  %v961_v44 = vsel %vm417_vm8, %v2961_v26, %v2962_v5  ;;  %v972_v45 = vsel %vm429_vm7, %v2966_v33, %v2967_v7 }
 0x3c1   : > { %v955_v9 = vpop.permute.xlu0 %954  ;;  %v966_v10 = vpop.permute.xlu1 %965  ;;  %1066 = vmatpush1.bf16.msra.mxu1 %v1037_v8  ;;  %v1035_v11 = vpack.c.bf16 %v972_v45, %v961_v44 }
 0x3c2   : > { %v960_v1 = vsel %vm417_vm8, %v955_v9, %v2961_v26  ;;  %v971_v15 = vsel %vm429_vm7, %v966_v10, %v2966_v33  ;;  %2746 = vmatpush3.bf16.msra.mxu0 %v1036_v43 }
 0x3c3   : > { %v1034_v17 = vpack.c.bf16 %v971_v15, %v960_v1  ;;  %1067 = vmatprep.subr.bf16.mxu1 %v1035_v11  ;;  %2747 = vmatprep.subr.bf16.mxu0 %v3187_v0 }
 0x3c5   : > { %v2970_v19 = vpop.permute.xlu0 %2969  ;;  %1068 = vmatpush1.bf16.msra.mxu1 %v1034_v17  ;;  %v944_v24 = vpop.permute.xlu1 %943 }
 0x3c6   : > { %v2972_v27 = vunpack.i.h.bf16 %v2970_v19  ;;  %v2971_v30 = vunpack.i.l.bf16 %v2970_v19 }
 0x3c8   : > { %v1033_v49 = vpack.c.bf16 %v2972_v27, %v3482_v3  ;;  %v949_v50 = vsel %vm405_vm9, %v944_v24, %v2971_v30  ;;  %v950_v51 = vsel %vm405_vm9, %v2971_v30, %v2972_v27 }
 0x3c9   : > { %v1031_v52 = vpack.c.bf16 %v949_v50, %v3474_v12  ;;  %v1032_v53 = vpack.c.bf16 %v950_v51, %v3477_v13 }
 0x3ca   : > { %2748 = vmatpush3.bf16.msra.mxu0 %v1033_v49 }
 0x3cb   : > { %1069 = vmatprep.subr.bf16.mxu1 %v1032_v53  ;;  %2759 = vmatprep.subr.bf16.mxu0 %v3187_v0  ;;  %v3641_v53 = vld [vmem:[%s3266_s11 + $0x30] sm:$0xff] }
 0x3cc   : > { %1070 = vmatpush1.bf16.msra.mxu1 %v1031_v52 }
 0x3cd   : > { %2750 = vmatmul.mubr.msk.bf16.vlgmr.msra.gmra.mxu0 %vm515_vm10, %v3342_v14  ;;  %2576 = vmatprep.subr.bf16.mxu1 %v3358_v21 }
 0x3ce   : > { %2769 = vmatprep.mubr.msk.bf16.mxu0 %vm3195_vm0, %v3187_v0 }
 0x3cf   : > { %2488 = vmatmul.mubr.msk.bf16.vlgmr.msra.gmra.mxu1 %vm515_vm10, %v3342_v14 }
 0x3d0   : > { %2577 = vmatpush3.bf16.msra.mxu1 %v3363_v22 }
 0x3d1   : > { %2578 = vmatprep.subr.bf16.mxu1 %v3368_v23 }
 0x3d4   : > { %2579 = vmatpush3.bf16.msra.mxu1 %v3375_v28 }
 0x3d5   : > { %2580 = vmatprep.subr.bf16.mxu1 %v3382_v31 }
 0x3d8   : > { %2581 = vmatpush3.bf16.msra.mxu1 %v3389_v32 }
 0x3d9   : > { %2582 = vmatprep.subr.bf16.mxu1 %v3395_v34 }
 0x3dc   : > { %2583 = vmatpush3.bf16.msra.mxu1 %v3402_v35 }
 0x3dd   : > { %2584 = vmatprep.subr.bf16.mxu1 %v3408_v36 }
 0x3e0   : > { %2585 = vmatpush3.bf16.msra.mxu1 %v3414_v37 }
 0x3e1   : > { %2586 = vmatprep.subr.bf16.mxu1 %v3420_v38 }
 0x3e4   : > { %2587 = vmatpush3.bf16.msra.mxu1 %v3426_v39 }
 0x3e5   : > { %2588 = vmatprep.subr.bf16.mxu1 %v3433_v40 }
 0x3e8   : > { %2589 = vmatpush3.bf16.msra.mxu1 %v3438_v41 }
 0x3e9   : > { %2590 = vmatprep.subr.bf16.mxu1 %v3450_v47 }
 0x3ec   : > { %2591 = vmatpush3.bf16.msra.mxu1 %v3456_v48 }
 0x3ed   : > { %2753 = vmatprep.subr.bf16.mxu1 %v3187_v0 }
 0x478   : > { %v3618_v12 = vpop.f32.mrf.mxu1 }
 0x47a   : > { %v2737_v13 = vpop.f32.mrf.mxu1 }
 0x47b   : > { %v3644_v13 = vld [vmem:[%s3266_s11 + $0x38] sm:$0xff] }
 0x47c   : > { %v3620_v3 = vpop.f32.mrf.mxu1 }
 0x47e   : > { %v2738_v16 = vpop.f32.mrf.mxu1 }
 0x47f   : > { %v2983_v16 = vpack.i.bf16 %v3644_v13, %v3641_v53 }
 0x48d   : > { %v1130_v54 = vpop.f32.mrf.mxu0 }
 0x48e   : > { %v1131_v55 = vadd.f32 %v1130_v54, %v3351_v2  ;;  %v3649_v54 = vld [vmem:[%s3266_s11 + $0x40] sm:$0xff] }
 0x48f   : > { %v1089_v18 = vpop.f32.mrf.mxu1  ;;  %v2751_v20 = vpop.f32.mrf.mxu0 }
 0x490   : > { %v1090_v56 = vadd.f32 %v1089_v18, %v3351_v2  ;;  %v1138_v61 = vmax.f32 %v1131_v55, 0.0  ;;  %v2988_v18 = vpack.i.bf16 %v3649_v54, %v3644_v13 }
 0x491   : > { %v1091_v57 = vpop.f32.mrf.mxu1  ;;  %v1133_v58 = vpop.f32.mrf.mxu0 }
 0x492   : > { %v1136_v59 = vmax.f32 %v1090_v56, 0.0  ;;  %v1092_v25 = vadd.f32 %v1091_v57, %v3351_v2 }
 0x493   : > { %v1093_v29 = vpop.f32.mrf.mxu1  ;;  %v2752_v60 = vpop.f32.mrf.mxu0 }
 0x494   : > { %v1137_v62 = vmax.f32 %v1092_v25, 0.0  ;;  %1142 = vrot.lane.b32.xlu1 %v1136_v59, %s3193_s17 }
 0x495   : > { %v1094_v63 = vpop.f32.mrf.mxu1 }
 0x496   : > { %v2973_v4 = vpack.i.bf16 %v1138_v61, %v1137_v62 }
 0x498   : > { %2974 = vrot.lane.b32.xlu0 %v2973_v4, %s3193_s17 }
 0x506   : > { %v1143_v33 = vpop.permute.xlu1 %1142 }
 0x50a   : > { %v2975_v5 = vpop.permute.xlu0 %2974 }
 0x50b   : > { %v2977_v26 = vunpack.i.h.bf16 %v2975_v5  ;;  %v2976_v7 = vunpack.i.l.bf16 %v2975_v5 }
 0x50d   : > { %v1155_v8 = vmax.f32 %v1138_v61, %v2977_v26  ;;  %v1149_v43 = vsel %vm429_vm7, %v2976_v7, %v2977_v26  ;;  %v1148_v44 = vsel %vm429_vm7, %v1143_v33, %v2976_v7 }
 0x50e   : > { %v1153_v45 = vmax.f32 %v1136_v59, %v1148_v44  ;;  %v1154_v9 = vmax.f32 %v1137_v62, %v1149_v43 }
 0x510   : > { %1159 = vrot.lane.b32.xlu1 %v1153_v45, %s3197_s19  ;;  %v2978_v10 = vpack.i.bf16 %v1155_v8, %v1154_v9 }
 0x512   : > { %2979 = vrot.lane.b32.xlu0 %v2978_v10, %s3197_s19 }
 0x514   : > { %1423 = vrot.lane.b32.xlu1 %v3649_v54, %s3189_s13 }
 0x516   : > { %2984 = vrot.lane.b32.xlu0 %v2983_v16, %s3189_s13 }
 0x518   : > { %2994 = vrot.lane.b32.xlu1 %v2988_v18, %s3190_s14 }
 0x51a   : > { %2989 = vrot.lane.b32.xlu0 %v2988_v18, %s3188_s12 }
 0x582   : > { %v1160_v17 = vpop.permute.xlu1 %1159 }
 0x584   : > { %v2980_v11 = vpop.permute.xlu0 %2979 }
 0x585   : > { %v2982_v1 = vunpack.i.h.bf16 %v2980_v11  ;;  %v2981_v15 = vunpack.i.l.bf16 %v2980_v11 }
 0x586   : > { %v1424_v55 = vpop.permute.xlu1 %1423 }
 0x587   : > { %v1165_v19 = vsel %vm405_vm9, %v1160_v17, %v2981_v15  ;;  %v1166_v24 = vsel %vm405_vm9, %v2981_v15, %v2982_v1  ;;  %v1172_v51 = vmax.f32 %v1155_v8, %v2982_v1  ;;  %v1444_v57 = vpack.c.bf16 %v1424_v55, %v1424_v55 }
 0x588   : > { %v1170_v27 = vmax.f32 %v1153_v45, %v1165_v19  ;;  %v1171_v30 = vmax.f32 %v1154_v9, %v1166_v24  ;;  %v3658_v20 = vpop.permute.xlu0 %2984 }
 0x589   : > { %v1175_v52 = vpack.c.bf16 %v1172_v51, %v1172_v51  ;;  %v2987_v56 = vunpack.i.h.bf16 %v3658_v20  ;;  %v1452_v59 = vsel %vm519_vm4, %v1444_v57, 0 }
 0x58a   : > { %v1174_v49 = vpack.c.bf16 %v1171_v30, %v1171_v30  ;;  %v1173_v50 = vpack.c.bf16 %v1170_v27, %v1170_v27  ;;  %v3669_v29 = vpop.permute.xlu1 %2994 }
 0x58b   : > { %v3664_v58 = vsel %vm489_vm2, %v2987_v56, %v1424_v55  ;;  %v2997_v62 = vunpack.i.h.bf16 %v3669_v29  ;;  %v2996_v63 = vunpack.i.l.bf16 %v3669_v29 }
 0x58c   : > { %1211 = vmatprep.mubr.bf16.mxu1 %v1174_v49  ;;  %v3667_v25 = vpop.permute.xlu0 %2989 }
 0x58d   : > { %1212 = vmatmul.mubr.bf16.vlgmr.msra.gmra.mxu1 %v1173_v50  ;;  %v2992_v60 = vunpack.i.h.bf16 %v3667_v25  ;;  %v2991_v61 = vunpack.i.l.bf16 %v3667_v25  ;;  %v3684_v26 = vsel %vm477_vm3, %v2996_v63, %v2997_v62 }
 0x58e   : > { %2754 = vmatpush3.bf16.msra.mxu1 %v3445_v46  ;;  %2755 = vmatprep.mubr.msk.bf16.mxu1 %vm3195_vm0, %v3187_v0 }
 0x58f   : > { %2773 = vmatprep.subr.bf16.mxu1 %v3187_v0  ;;  %v1441_v4 = vpack.c.bf16 %v2997_v62, %v2992_v60  ;;  %v3679_v5 = vsel %vm465_vm1, %v2991_v61, %v2992_v60 }
 0x590   : > { %v1440_v7 = vpack.c.bf16 %v3684_v26, %v3679_v5 }
 0x595   : > { %2756 = vmatmul.mubr.msk.bf16.vlgmr.msra.gmra.mxu1 %vm751_vm13, %v1175_v52 }
 0x596   : > { %2783 = vmatprep.mubr.msk.bf16.mxu1 %vm3195_vm0, %v3187_v0  ;;  %2774 = vmatpush3.bf16.msra.mxu1 %v1452_v59 }
 0x597   : > { %2775 = vmatprep.subr.bf16.mxu1 %v3187_v0 }
 0x59a   : > { %2776 = vmatpush3.bf16.msra.mxu1 %v1441_v4 }
 0x59b   : > { %2777 = vmatprep.subr.bf16.mxu1 %v3187_v0 }
 0x64d   : > { %v2592_v33 = vpop.f32.mrf.mxu1 }
 0x64f   : > { %v2593_v8 = vpop.f32.mrf.mxu1 }
 0x650   : > { %v2594_v45 = vadd.f32 %v2593_v8, %v2592_v33  ;;  %v1443_v8 = vpack.c.bf16 %v3664_v58, %v3664_v58 }
 0x651   : > { %v2595_v43 = vpop.f32.mrf.mxu1 }
 0x653   : > { %v2596_v44 = vpop.f32.mrf.mxu1 }
 0x655   : > { %v1253_v9 = vpop.f32.mrf.mxu1 }
 0x656   : > { %v1254_v10 = vadd.f32 %v2594_v45, %v1253_v9 }
 0x657   : > { %v2757_v11 = vpop.f32.mrf.mxu1 }
 0x658   : > { %1275 = vrot.lane.b32.xlu1 %v1254_v10, %s3191_s15  ;;  %1281 = vrot.lane.b32.xlu0 %v1254_v10, %s3199_s25 }
 0x659   : > { %v1256_v1 = vpop.f32.mrf.mxu1 }
 0x65b   : > { %v2758_v15 = vpop.f32.mrf.mxu1 }
 0x65c   : > { %1269 = vrot.lane.b32.xlu1 %v1254_v10, %s3200_s26  ;;  %1278 = vrot.lane.b32.xlu0 %v1254_v10, %s3201_s29 }
 0x660   : > { %1263 = vrot.lane.b32.xlu1 %v1254_v10, %s3194_s18  ;;  %1272 = vrot.lane.b32.xlu0 %v1254_v10, %s3202_s30 }
 0x664   : > { %1408 = vrot.lane.b32.xlu1 %v3641_v53, %s3190_s14  ;;  %1266 = vrot.lane.b32.xlu0 %v1254_v10, %s3203_s9 }
 0x668   : > { %1260 = vrot.lane.b32.xlu1 %v1254_v10, %s3197_s19  ;;  %1397 = vrot.lane.b32.xlu0 %v3641_v53, %s3188_s12 }
 0x66c   : > { %3004 = vrot.lane.b32.xlu1 %v2988_v18, %s3191_s15  ;;  %2999 = vrot.lane.b32.xlu0 %v2988_v18, %s3192_s16 }
 0x670   : > { %1386 = vrot.lane.b32.xlu1 %v3641_v53, %s3191_s15  ;;  %1375 = vrot.lane.b32.xlu0 %v3641_v53, %s3192_s16 }
 0x674   : > { %3014 = vrot.lane.b32.xlu1 %v2988_v18, %s3193_s17  ;;  %3009 = vrot.lane.b32.xlu0 %v2988_v18, %s3194_s18 }
 0x678   : > { %1364 = vrot.lane.b32.xlu1 %v3641_v53, %s3193_s17  ;;  %1353 = vrot.lane.b32.xlu0 %v3641_v53, %s3194_s18 }
 0x67c   : > { %3019 = vrot.lane.b32.xlu0 %v2988_v18, %s3197_s19  ;;  %1342 = vrot.lane.b32.xlu1 %v3641_v53, %s3197_s19  ;;  %v2986_v18 = vunpack.i.l.bf16 %v3658_v20 }
 0x67e   : > { %v1425_v4 = vsel %vm489_vm2, %v2986_v18, %v2987_v56 }
 0x67f   : > { %v1442_v43 = vpack.c.bf16 %v1425_v4, %v1425_v4 }
 0x681   : > { %v1446_v58 = vsel %vm519_vm4, %v1442_v43, 0 }
 0x6ca   : > { %v1282_v17 = vpop.permute.xlu0 %1281  ;;  %v1276_v19 = vpop.permute.xlu1 %1275 }
 0x6cb   : > { %v1288_v24 = vpack.c.bf16 %v1282_v17, %v1282_v17 }
 0x6cd   : > { %v1290_v27 = vsel %vm519_vm4, %v1288_v24, 0 }
 0x6ce   : > { %2760 = vmatpush3.bf16.msra.mxu0 %v1290_v27  ;;  %v1279_v30 = vpop.permute.xlu0 %1278  ;;  %v1270_v49 = vpop.permute.xlu1 %1269 }
 0x6cf   : > { %v1287_v50 = vpack.c.bf16 %v1279_v30, %v1276_v19  ;;  %2761 = vmatprep.subr.bf16.mxu0 %v3187_v0 }
 0x6d2   : > { %v1273_v51 = vpop.permute.xlu0 %1272  ;;  %2762 = vmatpush3.bf16.msra.mxu0 %v1287_v50  ;;  %v1264_v52 = vpop.permute.xlu1 %1263 }
 0x6d3   : > { %v1286_v16 = vpack.c.bf16 %v1273_v51, %v1270_v49  ;;  %2763 = vmatprep.subr.bf16.mxu0 %v3187_v0 }
 0x6d6   : > { %v1267_v55 = vpop.permute.xlu0 %1266  ;;  %2764 = vmatpush3.bf16.msra.mxu0 %v1286_v16  ;;  %v1409_v57 = vpop.permute.xlu1 %1408 }
 0x6d7   : > { %v1285_v59 = vpack.c.bf16 %v1267_v55, %v1264_v52  ;;  %2765 = vmatprep.subr.bf16.mxu0 %v3187_v0  ;;  %v1414_v25 = vsel %vm477_vm3, %v1409_v57, %v2996_v63 }
 0x6da   : > { %v1398_v60 = vpop.permute.xlu0 %1397  ;;  %2766 = vmatpush3.bf16.msra.mxu0 %v1285_v59  ;;  %v1261_v62 = vpop.permute.xlu1 %1260 }
 0x6db   : > { %v1284_v33 = vpack.c.bf16 %v1261_v62, %v1254_v10  ;;  %2767 = vmatprep.subr.bf16.mxu0 %v3187_v0  ;;  %v1403_v20 = vsel %vm465_vm1, %v1398_v60, %v2991_v61 }
 0x6dc   : > { %v1439_v61 = vpack.c.bf16 %v1414_v25, %v1403_v20 }
 0x6de   : > { %v3000_v44 = vpop.permute.xlu0 %2999  ;;  %2768 = vmatpush3.bf16.msra.mxu0 %v1284_v33  ;;  %v3005_v45 = vpop.permute.xlu1 %3004 }
 0x6df   : > { %v3002_v9 = vunpack.i.h.bf16 %v3000_v44  ;;  %v3001_v11 = vunpack.i.l.bf16 %v3000_v44  ;;  %v3007_v1 = vunpack.i.h.bf16 %v3005_v45  ;;  %v3006_v15 = vunpack.i.l.bf16 %v3005_v45  ;;  %2495 = vmatprep.subr.msk.bf16.mxu0 %vm519_vm4, %v1443_v8 }
 0x6e1   : > { %v1438_v56 = vpack.c.bf16 %v3007_v1, %v3002_v9  ;;  %2770 = vmatmul.mubr.msk.bf16.vlgmr.msra.gmra.mxu0 %vm515_vm10, %v3563_v42  ;;  %v1382_v19 = vsel %vm441_vm6, %v3001_v11, %v3002_v9  ;;  %v1393_v24 = vsel %vm453_vm5, %v3006_v15, %v3007_v1 }
 0x6e2   : > { %v1376_v10 = vpop.permute.xlu0 %1375  ;;  %1461 = vmatpush1.bf16.msra.mxu0 %v1446_v58  ;;  %v1387_v17 = vpop.permute.xlu1 %1386  ;;  %1486 = vmatprep.mubr.bf16.mxu0 %v3196_v6  ;;  %v1437_v49 = vpack.c.bf16 %v1393_v24, %v1382_v19 }
 0x6e3   : > { %1462 = vmatprep.subr.bf16.mxu0 %v1440_v7  ;;  %2778 = vmatpush3.bf16.msra.mxu1 %v1438_v56  ;;  %v1381_v27 = vsel %vm441_vm6, %v1376_v10, %v3001_v11  ;;  %v1392_v30 = vsel %vm453_vm5, %v1387_v17, %v3006_v15 }
 0x6e4   : > { %2779 = vmatprep.subr.bf16.mxu1 %v3187_v0  ;;  %v1436_v18 = vpack.c.bf16 %v1392_v30, %v1381_v27 }
 0x6e6   : > { %v3010_v50 = vpop.permute.xlu0 %3009  ;;  %v3015_v51 = vpop.permute.xlu1 %3014  ;;  %1463 = vmatpush1.bf16.msra.mxu0 %v1439_v61 }
 0x6e7   : > { %v3012_v52 = vunpack.i.h.bf16 %v3010_v50  ;;  %v3011_v29 = vunpack.i.l.bf16 %v3010_v50  ;;  %v3017_v16 = vunpack.i.h.bf16 %v3015_v51  ;;  %v3016_v63 = vunpack.i.l.bf16 %v3015_v51  ;;  %1464 = vmatprep.subr.bf16.mxu0 %v1437_v49 }
 0x6e9   : > { %v1435_v5 = vpack.c.bf16 %v3017_v16, %v3012_v52  ;;  %v1360_v26 = vsel %vm417_vm8, %v3011_v29, %v3012_v52  ;;  %v1371_v7 = vsel %vm429_vm7, %v3016_v63, %v3017_v16 }
 0x6ea   : > { %v1354_v55 = vpop.permute.xlu0 %1353  ;;  %v1365_v57 = vpop.permute.xlu1 %1364  ;;  %1465 = vmatpush1.bf16.msra.mxu0 %v1436_v18  ;;  %v1434_v59 = vpack.c.bf16 %v1371_v7, %v1360_v26  ;;  %v3803_v7 = vld [vmem:[%s3266_s11 + $0x48] sm:$0xff] }
 0x6eb   : > { %v1359_v60 = vsel %vm417_vm8, %v1354_v55, %v3011_v29  ;;  %v1370_v62 = vsel %vm429_vm7, %v1365_v57, %v3016_v63  ;;  %2780 = vmatpush3.bf16.msra.mxu1 %v1435_v5  ;;  %v3806_v55 = vld [vmem:[%s3266_s11 + $0x50] sm:$0xff] }
 0x6ec   : > { %v1433_v4 = vpack.c.bf16 %v1370_v62, %v1359_v60  ;;  %1466 = vmatprep.subr.bf16.mxu0 %v1434_v59  ;;  %2781 = vmatprep.subr.bf16.mxu1 %v3187_v0  ;;  %v3033_v57 = vpack.i.bf16 %v3806_v55, %v3803_v7  ;;  %v3811_v59 = vld [vmem:[%s3266_s11 + $0x58] sm:$0xff] }
 0x6ed   : > { %v3038_v60 = vpack.i.bf16 %v3811_v59, %v3806_v55 }
 0x6ee   : > { %v3020_v33 = vpop.permute.xlu0 %3019  ;;  %1467 = vmatpush1.bf16.msra.mxu0 %v1433_v4  ;;  %v1343_v8 = vpop.permute.xlu1 %1342 }
 0x6ef   : > { %v3022_v43 = vunpack.i.h.bf16 %v3020_v33  ;;  %v3021_v44 = vunpack.i.l.bf16 %v3020_v33 }
 0x6f1   : > { %v1432_v45 = vpack.c.bf16 %v3022_v43, %v3649_v54  ;;  %v1348_v9 = vsel %vm405_vm9, %v1343_v8, %v3021_v44  ;;  %v1349_v11 = vsel %vm405_vm9, %v3021_v44, %v3022_v43 }
 0x6f2   : > { %v1430_v1 = vpack.c.bf16 %v1348_v9, %v3641_v53  ;;  %v1431_v15 = vpack.c.bf16 %v1349_v11, %v3644_v13 }
 0x6f3   : > { %2782 = vmatpush3.bf16.msra.mxu1 %v1432_v45 }
 0x6f4   : > { %1468 = vmatprep.subr.bf16.mxu0 %v1431_v15  ;;  %2787 = vmatprep.subr.bf16.mxu1 %v3187_v0 }
 0x6f5   : > { %1469 = vmatpush1.bf16.msra.mxu0 %v1430_v1 }
 0x6f6   : > { %2784 = vmatmul.mubr.msk.bf16.vlgmr.msra.gmra.mxu1 %vm515_vm10, %v3342_v14  ;;  %2612 = vmatprep.subr.bf16.mxu0 %v3358_v21 }
 0x6f7   : > { %2788 = vmatpush3.bf16.msra.mxu1 %v3445_v46  ;;  %2789 = vmatprep.mubr.msk.bf16.mxu1 %vm3195_vm0, %v3187_v0 }
 0x6f8   : > { %2496 = vmatmul.mubr.msk.bf16.vlgmr.msra.gmra.mxu0 %vm515_vm10, %v3342_v14  ;;  %2793 = vmatprep.subr.bf16.mxu1 %v3187_v0 }
 0x6f9   : > { %2613 = vmatpush3.bf16.msra.mxu0 %v3363_v22 }
 0x6fa   : > { %2614 = vmatprep.subr.bf16.mxu0 %v3368_v23 }
 0x6fd   : > { %2615 = vmatpush3.bf16.msra.mxu0 %v3375_v28 }
 0x6fe   : > { %2616 = vmatprep.subr.bf16.mxu0 %v3382_v31 }
 0x701   : > { %2617 = vmatpush3.bf16.msra.mxu0 %v3389_v32 }
 0x702   : > { %2618 = vmatprep.subr.bf16.mxu0 %v3395_v34 }
 0x705   : > { %2619 = vmatpush3.bf16.msra.mxu0 %v3402_v35 }
 0x706   : > { %2620 = vmatprep.subr.bf16.mxu0 %v3408_v36 }
 0x709   : > { %2621 = vmatpush3.bf16.msra.mxu0 %v3414_v37 }
 0x70a   : > { %2622 = vmatprep.subr.bf16.mxu0 %v3420_v38 }
 0x70d   : > { %2623 = vmatpush3.bf16.msra.mxu0 %v3426_v39 }
 0x70e   : > { %2624 = vmatprep.subr.bf16.mxu0 %v3433_v40 }
 0x711   : > { %2625 = vmatpush3.bf16.msra.mxu0 %v3438_v41 }
 0x712   : > { %2626 = vmatprep.subr.bf16.mxu0 %v3450_v47 }
 0x715   : > { %2627 = vmatpush3.bf16.msra.mxu0 %v3456_v48 }
 0x716   : > { %2807 = vmatprep.subr.bf16.mxu0 %v3187_v0 }
 0x7a1   : > { %v3782_v14 = vpop.f32.mrf.mxu0 }
 0x7a3   : > { %v2771_v21 = vpop.f32.mrf.mxu0 }
 0x7a5   : > { %v3784_v22 = vpop.f32.mrf.mxu0 }
 0x7a7   : > { %v2772_v23 = vpop.f32.mrf.mxu0 }
 0x7b6   : > { %v1529_v28 = vpop.f32.mrf.mxu1 }
 0x7b7   : > { %v1530_v34 = vadd.f32 %v1529_v28, %v3351_v2 }
 0x7b8   : > { %v1488_v31 = vpop.f32.mrf.mxu0  ;;  %v2785_v32 = vpop.f32.mrf.mxu1 }
 0x7b9   : > { %v1489_v35 = vadd.f32 %v1488_v31, %v3351_v2  ;;  %v1537_v47 = vmax.f32 %v1530_v34, 0.0 }
 0x7ba   : > { %v1490_v36 = vpop.f32.mrf.mxu0  ;;  %v1532_v37 = vpop.f32.mrf.mxu1 }
 0x7bb   : > { %v1535_v38 = vmax.f32 %v1489_v35, 0.0  ;;  %v1491_v39 = vadd.f32 %v1490_v36, %v3351_v2 }
 0x7bc   : > { %v1492_v40 = vpop.f32.mrf.mxu0  ;;  %v2786_v41 = vpop.f32.mrf.mxu1 }
 0x7bd   : > { %v1536_v48 = vmax.f32 %v1491_v39, 0.0  ;;  %1541 = vrot.lane.b32.xlu1 %v1535_v38, %s3193_s17 }
 0x7be   : > { %v1493_v53 = vpop.f32.mrf.mxu0 }
 0x7bf   : > { %v3023_v13 = vpack.i.bf16 %v1537_v47, %v1536_v48 }
 0x7c1   : > { %3024 = vrot.lane.b32.xlu0 %v3023_v13, %s3193_s17 }
 0x82f   : > { %v1542_v58 = vpop.permute.xlu1 %1541 }
 0x833   : > { %v3025_v54 = vpop.permute.xlu0 %3024 }
 0x834   : > { %v3027_v20 = vunpack.i.h.bf16 %v3025_v54  ;;  %v3026_v56 = vunpack.i.l.bf16 %v3025_v54 }
 0x836   : > { %v1554_v10 = vmax.f32 %v1537_v47, %v3027_v20  ;;  %v1548_v17 = vsel %vm429_vm7, %v3026_v56, %v3027_v20  ;;  %v1547_v19 = vsel %vm429_vm7, %v1542_v58, %v3026_v56 }
 0x837   : > { %v1552_v24 = vmax.f32 %v1535_v38, %v1547_v19  ;;  %v1553_v25 = vmax.f32 %v1536_v48, %v1548_v17 }
 0x839   : > { %1558 = vrot.lane.b32.xlu1 %v1552_v24, %s3197_s19  ;;  %v3028_v61 = vpack.i.bf16 %v1554_v10, %v1553_v25 }
 0x83b   : > { %3029 = vrot.lane.b32.xlu0 %v3028_v61, %s3197_s19 }
 0x83d   : > { %1822 = vrot.lane.b32.xlu1 %v3811_v59, %s3189_s13 }
 0x83f   : > { %3034 = vrot.lane.b32.xlu0 %v3033_v57, %s3189_s13 }
 0x841   : > { %3044 = vrot.lane.b32.xlu1 %v3038_v60, %s3190_s14 }
 0x843   : > { %3039 = vrot.lane.b32.xlu0 %v3038_v60, %s3188_s12 }
 0x8ab   : > { %v1559_v50 = vpop.permute.xlu1 %1558 }
 0x8ad   : > { %v3030_v27 = vpop.permute.xlu0 %3029 }
 0x8ae   : > { %v3032_v30 = vunpack.i.h.bf16 %v3030_v27  ;;  %v3031_v49 = vunpack.i.l.bf16 %v3030_v27 }
 0x8af   : > { %v1823_v4 = vpop.permute.xlu1 %1822 }
 0x8b0   : > { %v1571_v51 = vmax.f32 %v1554_v10, %v3032_v30  ;;  %v1564_v52 = vsel %vm405_vm9, %v1559_v50, %v3031_v49  ;;  %v1565_v29 = vsel %vm405_vm9, %v3031_v49, %v3032_v30  ;;  %v1843_v8 = vpack.c.bf16 %v1823_v4, %v1823_v4 }
 0x8b1   : > { %v1569_v16 = vmax.f32 %v1552_v24, %v1564_v52  ;;  %v1570_v63 = vmax.f32 %v1553_v25, %v1565_v29  ;;  %v3820_v62 = vpop.permute.xlu0 %3034 }
 0x8b2   : > { %v1574_v18 = vpack.c.bf16 %v1571_v51, %v1571_v51  ;;  %v3037_v33 = vunpack.i.h.bf16 %v3820_v62  ;;  %v1851_v44 = vsel %vm519_vm4, %v1843_v8, 0  ;;  %v3036_v25 = vunpack.i.l.bf16 %v3820_v62 }
 0x8b3   : > { %v1573_v5 = vpack.c.bf16 %v1570_v63, %v1570_v63  ;;  %v1572_v26 = vpack.c.bf16 %v1569_v16, %v1569_v16  ;;  %v3831_v9 = vpop.permute.xlu1 %3044 }
 0x8b4   : > { %2790 = vmatmul.mubr.msk.bf16.vlgmr.msra.gmra.mxu1 %vm751_vm13, %v1574_v18  ;;  %v3826_v43 = vsel %vm489_vm2, %v3037_v33, %v1823_v4  ;;  %v3047_v15 = vunpack.i.h.bf16 %v3831_v9  ;;  %v3046_v21 = vunpack.i.l.bf16 %v3831_v9  ;;  %v1824_v51 = vsel %vm489_vm2, %v3036_v25, %v3037_v33  ;;  %v3166_v25 = vld [vmem:[%s4115_s3 + $0x68] sm:$0xff]  }
 0x8b5   : > { %1610 = vmatprep.mubr.bf16.mxu0 %v1573_v5  ;;  %2803 = vmatprep.mubr.msk.bf16.mxu1 %vm3195_vm0, %v3187_v0  ;;  %v3829_v45 = vpop.permute.xlu0 %3039  ;;  %v1842_v29 = vpack.c.bf16 %v3826_v43, %v3826_v43  ;;  %v1841_v16 = vpack.c.bf16 %v1824_v51, %v1824_v51  ;;  %v3172_v51 = vld [vmem:[%s4115_s3 + $0x50] sm:$0xff]  }
 0x8b6   : > { %1611 = vmatmul.mubr.bf16.vlgmr.msra.gmra.mxu0 %v1572_v26  ;;  %v3042_v11 = vunpack.i.h.bf16 %v3829_v45  ;;  %v3041_v1 = vunpack.i.l.bf16 %v3829_v45  ;;  %v3846_v31 = vsel %vm477_vm3, %v3046_v21, %v3047_v15 }
 0x8b7   : > { %2817 = vmatprep.mubr.msk.bf16.mxu0 %vm3195_vm0, %v3187_v0  ;;  %2808 = vmatpush3.bf16.msra.mxu0 %v1851_v44  ;;  %v1845_v33 = vsel %vm519_vm4, %v1841_v16, 0  ;;  %v3175_v16 = vld [vmem:[%s4115_s3 + $0x8] sm:$0xff]  }
 0x8b8   : > { %2809 = vmatprep.subr.bf16.mxu0 %v3187_v0  ;;  %v1840_v23 = vpack.c.bf16 %v3047_v15, %v3042_v11  ;;  %v3841_v28 = vsel %vm465_vm1, %v3041_v1, %v3042_v11 }
 0x8b9   : > { %v1839_v32 = vpack.c.bf16 %v3846_v31, %v3841_v28 }
 0x8bb   : > { %2810 = vmatpush3.bf16.msra.mxu0 %v1840_v23 }
 0x8bc   : > { %2811 = vmatprep.subr.bf16.mxu0 %v3187_v0 }
 0x974   : > { %v1652_v34 = vpop.f32.mrf.mxu1 }
 0x976   : > { %v2628_v35 = vpop.f32.mrf.mxu0  ;;  %v2791_v36 = vpop.f32.mrf.mxu1 }
 0x978   : > { %v2629_v37 = vpop.f32.mrf.mxu0  ;;  %v1655_v38 = vpop.f32.mrf.mxu1 }
 0x979   : > { %v2630_v39 = vadd.f32 %v2629_v37, %v2628_v35 }
 0x97a   : > { %v2631_v40 = vpop.f32.mrf.mxu0  ;;  %v2792_v41 = vpop.f32.mrf.mxu1 }
 0x97b   : > { %v1653_v47 = vadd.f32 %v2630_v39, %v1652_v34 }
 0x97c   : > { %v2632_v48 = vpop.f32.mrf.mxu0 }
 0x97d   : > { %1674 = vrot.lane.b32.xlu1 %v1653_v47, %s3191_s15  ;;  %1680 = vrot.lane.b32.xlu0 %v1653_v47, %s3199_s25 }
 0x981   : > { %1668 = vrot.lane.b32.xlu1 %v1653_v47, %s3200_s26  ;;  %1677 = vrot.lane.b32.xlu0 %v1653_v47, %s3201_s29 }
 0x985   : > { %1662 = vrot.lane.b32.xlu1 %v1653_v47, %s3194_s18  ;;  %1671 = vrot.lane.b32.xlu0 %v1653_v47, %s3202_s30 }
 0x989   : > { %1807 = vrot.lane.b32.xlu1 %v3803_v7, %s3190_s14  ;;  %1665 = vrot.lane.b32.xlu0 %v1653_v47, %s3203_s9  ;;  %s2459_s14 = sshll.u32 %s2452_s28, 1 }
 0x98a   : > { %p307_p4 = scmp.lt.s32.totalorder %s2459_s14, 3 }
 0x98c   : > { %s4124_s14 = smov (!%p307_p4, %s2459_s14), 3 }
 0x98d   : > { %1659 = vrot.lane.b32.xlu1 %v1653_v47, %s3197_s19  ;;  %1796 = vrot.lane.b32.xlu0 %v3803_v7, %s3188_s12 }
 0x991   : > { %3054 = vrot.lane.b32.xlu1 %v3038_v60, %s3191_s15  ;;  %3049 = vrot.lane.b32.xlu0 %v3038_v60, %s3192_s16 }
 0x995   : > { %1785 = vrot.lane.b32.xlu1 %v3803_v7, %s3191_s15  ;;  %1774 = vrot.lane.b32.xlu0 %v3803_v7, %s3192_s16  ;;  %s2460_s16 = sshll.u32 %s4124_s14, 3 }
 0x996   : > { %s310_s23 = scalar_lea.vmem %s4120_s8, %s2460_s16 }
 0x999   : > { %3064 = vrot.lane.b32.xlu1 %v3038_v60, %s3193_s17  ;;  %3059 = vrot.lane.b32.xlu0 %v3038_v60, %s3194_s18 }
 0x99d   : > { %1763 = vrot.lane.b32.xlu1 %v3803_v7, %s3193_s17  ;;  %1752 = vrot.lane.b32.xlu0 %v3803_v7, %s3194_s18 }
 0x9a1   : > { %3069 = vrot.lane.b32.xlu0 %v3038_v60, %s3197_s19  ;;  %1741 = vrot.lane.b32.xlu1 %v3803_v7, %s3197_s19 }
 0x9ef   : > { %v1681_v53 = vpop.permute.xlu0 %1680  ;;  %v1675_v13 = vpop.permute.xlu1 %1674 }
 0x9f0   : > { %v1687_v54 = vpack.c.bf16 %v1681_v53, %v1681_v53 }
 0x9f2   : > { %v1689_v20 = vsel %vm519_vm4, %v1687_v54, 0 }
 0x9f3   : > { %2794 = vmatpush3.bf16.msra.mxu1 %v1689_v20  ;;  %v1678_v56 = vpop.permute.xlu0 %1677  ;;  %v1669_v58 = vpop.permute.xlu1 %1668 }
 0x9f4   : > { %v1686_v10 = vpack.c.bf16 %v1678_v56, %v1675_v13  ;;  %2795 = vmatprep.subr.bf16.mxu1 %v3187_v0 }
 0x9f7   : > { %v1672_v17 = vpop.permute.xlu0 %1671  ;;  %2796 = vmatpush3.bf16.msra.mxu1 %v1686_v10  ;;  %v1663_v19 = vpop.permute.xlu1 %1662 }
 0x9f8   : > { %v1685_v24 = vpack.c.bf16 %v1672_v17, %v1669_v58  ;;  %2797 = vmatprep.subr.bf16.mxu1 %v3187_v0 }
 0x9fb   : > { %v1666_v61 = vpop.permute.xlu0 %1665  ;;  %2798 = vmatpush3.bf16.msra.mxu1 %v1685_v24  ;;  %v1808_v27 = vpop.permute.xlu1 %1807  ;;  %v3161_v24 = vld [vmem:[%s4113_s1] sm:$0xf] }
 0x9fc   : > { %v1684_v30 = vpack.c.bf16 %v1666_v61, %v1663_v19  ;;  %2799 = vmatprep.subr.bf16.mxu1 %v3187_v0  ;;  %v1813_v45 = vsel %vm477_vm3, %v1808_v27, %v3046_v21  ;;  %v3167_v61 = vld [vmem:[%s4115_s3 + $0x28] sm:$0xff]   ;;  %v3168_v27 = vld [vmem:[%s4115_s3 + $0x60] sm:$0xff]  }
 0x9ff   : > { %v1797_v49 = vpop.permute.xlu0 %1796  ;;  %2800 = vmatpush3.bf16.msra.mxu1 %v1684_v30  ;;  %v1660_v50 = vpop.permute.xlu1 %1659  ;;  %v3169_v30 = vld [vmem:[%s4115_s3 + $0x20] sm:$0xff]  }
 0xa00   : > { %v1683_v52 = vpack.c.bf16 %v1660_v50, %v1653_v47  ;;  %2801 = vmatprep.subr.bf16.mxu1 %v3187_v0  ;;  %v1802_v62 = vsel %vm465_vm1, %v1797_v49, %v3041_v1  ;;  %v3170_v49 = vld [vmem:[%s4115_s3 + $0x58] sm:$0xff]   ;;  %vm2296_vm1 = vcmask 523264  }
 0xa01   : > { %v3171_v50 = vld [vmem:[%s4115_s3 + $0x18] sm:$0xff]  }
 0xa03   : > { %v3050_v63 = vpop.permute.xlu0 %3049  ;;  %2802 = vmatpush3.bf16.msra.mxu1 %v1683_v52  ;;  %v3055_v18 = vpop.permute.xlu1 %3054  ;;  %v3173_v52 = vld [vmem:[%s4115_s3 + $0x10] sm:$0xff]  }
 0xa04   : > { %v3052_v5 = vunpack.i.h.bf16 %v3050_v63  ;;  %v3051_v26 = vunpack.i.l.bf16 %v3050_v63  ;;  %v3057_v57 = vunpack.i.h.bf16 %v3055_v18  ;;  %v3056_v60 = vunpack.i.l.bf16 %v3055_v18  ;;  %2503 = vmatprep.subr.msk.bf16.mxu1 %vm519_vm4, %v1842_v29  ;;  %v3174_v29 = vld [vmem:[%s4115_s3 + $0x48] sm:$0xff]   ;;  %v3176_v63 = vld [vmem:[%s4115_s3 + $0x40] sm:$0xff]  }
 0xa05   : > { %v3177_v18 = vld [vmem:[%s4115_s3] sm:$0xff]  }
 0xa06   : > { %v1837_v4 = vpack.c.bf16 %v3057_v57, %v3052_v5  ;;  %2804 = vmatmul.mubr.msk.bf16.vlgmr.msra.gmra.mxu1 %vm515_vm10, %v3563_v42  ;;  %v1781_v44 = vsel %vm441_vm6, %v3051_v26, %v3052_v5  ;;  %v1792_v11 = vsel %vm453_vm5, %v3056_v60, %v3057_v57  ;;  %v1838_v42 = vpack.c.bf16 %v1813_v45, %v1802_v62 }
 0xa07   : > { %v1775_v8 = vpop.permute.xlu0 %1774  ;;  %1860 = vmatpush1.bf16.msra.mxu1 %v1845_v33  ;;  %v1786_v43 = vpop.permute.xlu1 %1785  ;;  %1885 = vmatprep.mubr.bf16.mxu1 %v3196_v6  ;;  %v1836_v23 = vpack.c.bf16 %v1792_v11, %v1781_v44 }
 0xa08   : > { %1861 = vmatprep.subr.bf16.mxu1 %v1839_v32  ;;  %2812 = vmatpush3.bf16.msra.mxu0 %v1837_v4  ;;  %v1780_v1 = vsel %vm441_vm6, %v1775_v8, %v3051_v26  ;;  %v1791_v15 = vsel %vm453_vm5, %v1786_v43, %v3056_v60 }
 0xa09   : > { %2813 = vmatprep.subr.bf16.mxu0 %v3187_v0  ;;  %v1835_v37 = vpack.c.bf16 %v1791_v15, %v1780_v1 }
 0xa0b   : > { %v3060_v34 = vpop.permute.xlu0 %3059  ;;  %v3065_v35 = vpop.permute.xlu1 %3064  ;;  %1862 = vmatpush1.bf16.msra.mxu1 %v1838_v42 }
 0xa0c   : > { %v3062_v6 = vunpack.i.h.bf16 %v3060_v34  ;;  %v3061_v9 = vunpack.i.l.bf16 %v3060_v34  ;;  %v3067_v36 = vunpack.i.h.bf16 %v3065_v35  ;;  %v3066_v21 = vunpack.i.l.bf16 %v3065_v35  ;;  %1863 = vmatprep.subr.bf16.mxu1 %v1836_v23 }
 0xa0e   : > { %v1834_v28 = vpack.c.bf16 %v3067_v36, %v3062_v6  ;;  %v1759_v31 = vsel %vm417_vm8, %v3061_v9, %v3062_v6  ;;  %v1770_v32 = vsel %vm429_vm7, %v3066_v21, %v3067_v36 }
 0xa0f   : > { %v1753_v38 = vpop.permute.xlu0 %1752  ;;  %v1764_v39 = vpop.permute.xlu1 %1763  ;;  %1864 = vmatpush1.bf16.msra.mxu1 %v1835_v37  ;;  %v1833_v40 = vpack.c.bf16 %v1770_v32, %v1759_v31 }
 0xa10   : > { %v1758_v41 = vsel %vm417_vm8, %v1753_v38, %v3061_v9  ;;  %v1769_v47 = vsel %vm429_vm7, %v1764_v39, %v3066_v21  ;;  %2814 = vmatpush3.bf16.msra.mxu0 %v1834_v28 }
 0xa11   : > { %v1832_v48 = vpack.c.bf16 %v1769_v47, %v1758_v41  ;;  %1865 = vmatprep.subr.bf16.mxu1 %v1833_v40  ;;  %2815 = vmatprep.subr.bf16.mxu0 %v3187_v0 }
 0xa13   : > { %v3070_v53 = vpop.permute.xlu0 %3069  ;;  %1866 = vmatpush1.bf16.msra.mxu1 %v1832_v48  ;;  %v1742_v13 = vpop.permute.xlu1 %1741 }
 0xa14   : > { %v3072_v54 = vunpack.i.h.bf16 %v3070_v53  ;;  %v3071_v20 = vunpack.i.l.bf16 %v3070_v53 }
 0xa16   : > { %v1831_v56 = vpack.c.bf16 %v3072_v54, %v3811_v59  ;;  %v1747_v58 = vsel %vm405_vm9, %v1742_v13, %v3071_v20  ;;  %v1748_v10 = vsel %vm405_vm9, %v3071_v20, %v3072_v54  ;;  %v3162_v59 = vld [vmem:[%s4115_s3 + $0x78] sm:$0xff]  }
 0xa17   : > { %v1829_v17 = vpack.c.bf16 %v1747_v58, %v3803_v7  ;;  %v1830_v19 = vpack.c.bf16 %v1748_v10, %v3806_v55  ;;  %v3163_v7 = vld [vmem:[%s4115_s3 + $0x38] sm:$0xff]   ;;  %v3164_v55 = vld [vmem:[%s4115_s3 + $0x70] sm:$0xff]  }
 0xa18   : > { %2816 = vmatpush3.bf16.msra.mxu0 %v1831_v56 }
 0xa19   : > { %1867 = vmatprep.subr.bf16.mxu1 %v1830_v19  ;;  %2821 = vmatprep.subr.bf16.mxu0 %v3187_v0 }
 0xa1a   : > { %1868 = vmatpush1.bf16.msra.mxu1 %v1829_v17 }
 0xa1b   : > { %2818 = vmatmul.mubr.msk.bf16.vlgmr.msra.gmra.mxu0 %vm515_vm10, %v3161_v24  ;;  %2648 = vmatprep.subr.bf16.mxu1 %v3162_v59 }
 0xa1c   : > { %2822 = vmatpush3.bf16.msra.mxu0 %v3445_v46  ;;  %2823 = vmatprep.mubr.msk.bf16.mxu0 %vm3195_vm0, %v3187_v0  ;;  %v3165_v46 = vld [vmem:[%s4115_s3 + $0x30] sm:$0xff]  }
 0xa1d   : > { %2504 = vmatmul.mubr.msk.bf16.vlgmr.msra.gmra.mxu1 %vm515_vm10, %v3161_v24  ;;  %2827 = vmatprep.subr.bf16.mxu0 %v3187_v0 }
 0xa1e   : > { %2649 = vmatpush3.bf16.msra.mxu1 %v3163_v7 }
 0xa1f   : > { %2650 = vmatprep.subr.bf16.mxu1 %v3164_v55 }
 0xa22   : > { %2651 = vmatpush3.bf16.msra.mxu1 %v3165_v46 }
 0xa23   : > { %2652 = vmatprep.subr.bf16.mxu1 %v3166_v25 }
 0xa26   : > { %2653 = vmatpush3.bf16.msra.mxu1 %v3167_v61 }
 0xa27   : > { %2654 = vmatprep.subr.bf16.mxu1 %v3168_v27 }
 0xa2a   : > { %2655 = vmatpush3.bf16.msra.mxu1 %v3169_v30 }
 0xa2b   : > { %2656 = vmatprep.subr.bf16.mxu1 %v3170_v49  ;;  %v392_v49 = vld [vmem:[%s4117_s5 + $0x8] sm:$0xff] }
 0xa2e   : > { %2657 = vmatpush3.bf16.msra.mxu1 %v3171_v50  ;;  %v391_v50 = vld [vmem:[%s4117_s5] sm:$0xff] }
 0xa2f   : > { %2658 = vmatprep.subr.bf16.mxu1 %v3172_v51 }
 0xa32   : > { %2659 = vmatpush3.bf16.msra.mxu1 %v3173_v52 }
 0xa33   : > { %2660 = vmatprep.subr.bf16.mxu1 %v3174_v29 }
 0xa36   : > { %2661 = vmatpush3.bf16.msra.mxu1 %v3175_v16 }
 0xa37   : > { %2662 = vmatprep.subr.bf16.mxu1 %v3176_v63 }
 0xa3a   : > { %2663 = vmatpush3.bf16.msra.mxu1 %v3177_v18 }
 0xa3b   : > { %2841 = vmatprep.subr.bf16.mxu1 %v3187_v0 }
 0xac6   : > { %v3977_v5 = vpop.f32.mrf.mxu1 }
 0xac8   : > { %v2805_v26 = vpop.f32.mrf.mxu1 }
 0xaca   : > { %v3979_v57 = vpop.f32.mrf.mxu1 }
 0xacc   : > { %v2806_v60 = vpop.f32.mrf.mxu1 }
 0xadb   : > { %v1928_v62 = vpop.f32.mrf.mxu0 }
 0xadc   : > { %v1929_v8 = vadd.f32 %v1928_v62, %v3351_v2 }
 0xadd   : > { %v1887_v4 = vpop.f32.mrf.mxu1  ;;  %v2819_v33 = vpop.f32.mrf.mxu0 }
 0xade   : > { %v1888_v43 = vadd.f32 %v1887_v4, %v3351_v2  ;;  %v1936_v23 = vmax.f32 %v1929_v8, 0.0 }
 0xadf   : > { %v1889_v44 = vpop.f32.mrf.mxu1  ;;  %v1931_v11 = vpop.f32.mrf.mxu0 }
 0xae0   : > { %v1934_v45 = vmax.f32 %v1888_v43, 0.0  ;;  %v1890_v42 = vadd.f32 %v1889_v44, %v3351_v2  ;;  %v3178_v11 = vld [vmem:[%s4116_s4] sm:$0xff]  }
 0xae1   : > { %v1891_v1 = vpop.f32.mrf.mxu1  ;;  %v2820_v15 = vpop.f32.mrf.mxu0 }
 0xae2   : > { %v1935_v34 = vmax.f32 %v1890_v42, 0.0  ;;  %1940 = vrot.lane.b32.xlu1 %v1934_v45, %s3193_s17 }
 0xae3   : > { %v1892_v35 = vpop.f32.mrf.mxu1 }
 0xae4   : > { %v3073_v6 = vpack.i.bf16 %v1936_v23, %v1935_v34 }
 0xae6   : > { %3074 = vrot.lane.b32.xlu0 %v3073_v6, %s3193_s17 }
 0xb54   : > { %v1941_v37 = vpop.permute.xlu1 %1940 }
 0xb58   : > { %v3075_v9 = vpop.permute.xlu0 %3074 }
 0xb59   : > { %v3077_v36 = vunpack.i.h.bf16 %v3075_v9  ;;  %v3076_v21 = vunpack.i.l.bf16 %v3075_v9 }
 0xb5b   : > { %v1953_v28 = vmax.f32 %v1936_v23, %v3077_v36  ;;  %v1947_v31 = vsel %vm429_vm7, %v3076_v21, %v3077_v36  ;;  %v1946_v32 = vsel %vm429_vm7, %v1941_v37, %v3076_v21 }
 0xb5c   : > { %v1952_v2 = vmax.f32 %v1935_v34, %v1947_v31  ;;  %v1951_v38 = vmax.f32 %v1934_v45, %v1946_v32  ;;  %v3121_v31 = vld [vmem:[%s4118_s6 + $0x68] sm:$0xff]   ;;  %v3128_v32 = vld [vmem:[%s4118_s6 + $0x90] sm:$0xff]  }
 0xb5e   : > { %v3078_v39 = vpack.i.bf16 %v1953_v28, %v1952_v2  ;;  %1957 = vrot.lane.b32.xlu1 %v1951_v38, %s3197_s19 }
 0xb60   : > { %3079 = vrot.lane.b32.xlu0 %v3078_v39, %s3197_s19  ;;  %v3131_v39 = vld [vmem:[%s4118_s6 + $0x88] sm:$0xff]  }
 0xbd0   : > { %v1958_v48 = vpop.permute.xlu1 %1957 }
 0xbd2   : > { %v3080_v40 = vpop.permute.xlu0 %3079 }
 0xbd3   : > { %v3082_v41 = vunpack.i.h.bf16 %v3080_v40  ;;  %v3081_v47 = vunpack.i.l.bf16 %v3080_v40  ;;  %v3124_v40 = vld [vmem:[%s4118_s6 + $0x20] sm:$0xff]  }
 0xbd5   : > { %v1970_v53 = vmax.f32 %v1953_v28, %v3082_v41  ;;  %v1963_v13 = vsel %vm405_vm9, %v1958_v48, %v3081_v47  ;;  %v1964_v54 = vsel %vm405_vm9, %v3081_v47, %v3082_v41  ;;  %v3120_v28 = vld [vmem:[%s4118_s6 + $0x30] sm:$0xff]   ;;  %v3126_v41 = vld [vmem:[%s4118_s6 + $0x58] sm:$0xff]  }
 0xbd6   : > { %v1968_v20 = vmax.f32 %v1951_v38, %v1963_v13  ;;  %v1969_v56 = vmax.f32 %v1952_v2, %v1964_v54  ;;  %v3122_v2 = vld [vmem:[%s4118_s6 + $0x28] sm:$0xff]   ;;  %v3123_v38 = vld [vmem:[%s4118_s6 + $0x60] sm:$0xff]   ;;  %v3127_v47 = vld [vmem:[%s4118_s6 + $0x18] sm:$0xff]  }
 0xbd7   : > { %v1973_v58 = vpack.c.bf16 %v1970_v53, %v1970_v53  ;;  %v3129_v48 = vld [vmem:[%s4118_s6 + $0x50] sm:$0xff]   ;;  %v3133_v13 = vld [vmem:[%s4118_s6 + $0x8] sm:$0xff]  }
 0xbd8   : > { %v1972_v10 = vpack.c.bf16 %v1969_v56, %v1969_v56  ;;  %v1971_v17 = vpack.c.bf16 %v1968_v20, %v1968_v20  ;;  %v3130_v53 = vld [vmem:[%s4118_s6 + $0x10] sm:$0xff]  }
 0xbd9   : > { %2824 = vmatmul.mubr.msk.bf16.vlgmr.msra.gmra.mxu0 %vm751_vm13, %v1973_v58 }
 0xbda   : > { %2009 = vmatprep.mubr.bf16.mxu1 %v1972_v10  ;;  %2837 = vmatprep.mubr.msk.bf16.mxu0 %vm3195_vm0, %v3187_v0 }
 0xbdb   : > { %2010 = vmatmul.mubr.bf16.vlgmr.msra.gmra.mxu1 %v1971_v17 }
 0xbdc   : > { %2849 = vmatprep.mubr.msk.bf16.mxu1 %vm3195_vm0, %v3187_v0  ;;  %vm2163_vm0 = vcmask 916480  }
 0xc99   : > { %v2051_v19 = vpop.f32.mrf.mxu0 }
 0xc9b   : > { %v2664_v24 = vpop.f32.mrf.mxu1  ;;  %v2825_v59 = vpop.f32.mrf.mxu0 }
 0xc9c   : > { %v3136_v59 = vld [vmem:[%s4118_s6] sm:$0xff]  }
 0xc9d   : > { %v2665_v7 = vpop.f32.mrf.mxu1  ;;  %v2054_v55 = vpop.f32.mrf.mxu0 }
 0xc9e   : > { %v2666_v46 = vadd.f32 %v2665_v7, %v2664_v24  ;;  %v3135_v24 = vld [vmem:[%s4118_s6 + $0x40] sm:$0xff]  }
 0xc9f   : > { %v2667_v25 = vpop.f32.mrf.mxu1  ;;  %v2826_v61 = vpop.f32.mrf.mxu0 }
 0xca0   : > { %v2052_v27 = vadd.f32 %v2666_v46, %v2051_v19  ;;  %v3134_v19 = vld [vmem:[%s4118_s6 + $0x80] sm:$0xff]  }
 0xca1   : > { %v2668_v30 = vpop.f32.mrf.mxu1 }
 0xca2   : > { %2073 = vrot.lane.b32.xlu1 %v2052_v27, %s3191_s15  ;;  %2079 = vrot.lane.b32.xlu0 %v2052_v27, %s3199_s25  ;;  %s3204_s25 = smov 80  }
 0xca6   : > { %2067 = vrot.lane.b32.xlu1 %v2052_v27, %s3200_s26  ;;  %2076 = vrot.lane.b32.xlu0 %v2052_v27, %s3201_s29  ;;  %s3205_s26 = smov 32   ;;  %s3206_s29 = smov 112  }
 0xcaa   : > { %2061 = vrot.lane.b32.xlu1 %v2052_v27, %s3194_s18  ;;  %2070 = vrot.lane.b32.xlu0 %v2052_v27, %s3202_s30 }
 0xcae   : > { %2058 = vrot.lane.b32.xlu1 %v2052_v27, %s3197_s19  ;;  %2064 = vrot.lane.b32.xlu0 %v2052_v27, %s3203_s9 }
 0xcb2   : > { %879 = vperm.xlu1 %3083, %v392_v49   ;;  %874 = vperm.xlu0 %2922, %v391_v50  }
 0xd14   : > { %v2074_v51 = vpop.permute.xlu1 %2073  ;;  %v2080_v52 = vpop.permute.xlu0 %2079 }
 0xd15   : > { %v2086_v29 = vpack.c.bf16 %v2080_v52, %v2080_v52 }
 0xd17   : > { %v2088_v16 = vsel %vm519_vm4, %v2086_v29, 0 }
 0xd18   : > { %v2068_v63 = vpop.permute.xlu1 %2067  ;;  %2828 = vmatpush3.bf16.msra.mxu0 %v2088_v16  ;;  %v2077_v18 = vpop.permute.xlu0 %2076 }
 0xd19   : > { %v2085_v26 = vpack.c.bf16 %v2077_v18, %v2074_v51  ;;  %2829 = vmatprep.subr.bf16.mxu0 %v3187_v0 }
 0xd1c   : > { %2830 = vmatpush3.bf16.msra.mxu0 %v2085_v26  ;;  %v2071_v60 = vpop.permute.xlu0 %2070  ;;  %v2062_v62 = vpop.permute.xlu1 %2061 }
 0xd1d   : > { %v2084_v4 = vpack.c.bf16 %v2071_v60, %v2068_v63  ;;  %2831 = vmatprep.subr.bf16.mxu0 %v3187_v0 }
 0xd20   : > { %2832 = vmatpush3.bf16.msra.mxu0 %v2084_v4  ;;  %v2065_v33 = vpop.permute.xlu0 %2064  ;;  %v2059_v43 = vpop.permute.xlu1 %2058 }
 0xd21   : > { %v2083_v8 = vpack.c.bf16 %v2065_v33, %v2062_v62  ;;  %2833 = vmatprep.subr.bf16.mxu0 %v3187_v0  ;;  %v2082_v44 = vpack.c.bf16 %v2059_v43, %v2052_v27 }
 0xd24   : > { %2834 = vmatpush3.bf16.msra.mxu0 %v2083_v8 }
 0xd25   : > { %2835 = vmatprep.subr.bf16.mxu0 %v3187_v0 }
 0xd28   : > { %2836 = vmatpush3.bf16.msra.mxu0 %v2082_v44 }
 0xd2b   : > { %2838 = vmatmul.mubr.msk.bf16.vlgmr.msra.gmra.mxu0 %vm515_vm10, %v3178_v11 }
 0xd2d   : > { %v4020_v45 = vpop.permute.xlu1 %879  ;;  %v4022_v42 = vpop.permute.xlu0 %874 }
 0xd2e   : > { %v1330_v1 = vadd.f32 %v3784_v22, %v4020_v45  ;;  %v1729_v15 = vadd.f32 %v3979_v57, %v4020_v45  ;;  %v1327_v23 = vadd.f32 %v3782_v14, %v4022_v42  ;;  %v1726_v34 = vadd.f32 %v3977_v5, %v4022_v42  ;;  %v3117_v14 = vld [vmem:[%s4118_s6 + $0x78] sm:$0xff]   ;;  %v3119_v5 = vld [vmem:[%s4118_s6 + $0x70] sm:$0xff]  }
 0xd2f   : > { %v3118_v22 = vld [vmem:[%s4118_s6 + $0x38] sm:$0xff]   ;;  %2678 = vmatprep.subr.bf16.mxu0 %v3117_v14  ;;  %v931_v25 = vadd.f32 %v3620_v3, %v4020_v45  ;;  %v928_v61 = vadd.f32 %v3618_v12, %v4022_v42 }
 0xd30   : > { %3137 = vtanh.f32 %v1330_v1  ;;  %v3125_v57 = vld [vmem:[%s4118_s6 + $0x98] sm:$0xff]   ;;  %2679 = vmatpush3.bf16.msra.mxu0 %v3118_v22  ;;  %v2508_v1 = vld [vmem:[%s4119_s7] ss:$0 sm:$0xff] }
 0xd31   : > { %3139 = vtanh.f32 %v1729_v15  ;;  %2680 = vmatprep.subr.bf16.mxu0 %v3119_v5  ;;  %2842 = vmatpush3.bf16.msra.mxu1 %v3125_v57 }
 0xd32   : > { %3141 = vtanh.f32 %v1327_v23  ;;  %2843 = vmatprep.subr.bf16.mxu1 %v3187_v0 }
 0xd33   : > { %3143 = vtanh.f32 %v1726_v34 }
 0xd34   : > { %2681 = vmatpush3.bf16.msra.mxu0 %v3120_v28 }
 0xd35   : > { %2682 = vmatprep.subr.bf16.mxu0 %v3121_v31  ;;  %2844 = vmatpush3.bf16.msra.mxu1 %v3128_v32 }
 0xd36   : > { %2845 = vmatprep.subr.bf16.mxu1 %v3187_v0 }
 0xd38   : > { %2683 = vmatpush3.bf16.msra.mxu0 %v3122_v2 }
 0xd39   : > { %2684 = vmatprep.subr.bf16.mxu0 %v3123_v38  ;;  %2846 = vmatpush3.bf16.msra.mxu1 %v3131_v39 }
 0xd3a   : > { %2847 = vmatprep.subr.bf16.mxu1 %v3187_v0  ;;  %v3132_v0 = vld [vmem:[%s4118_s6 + $0x48] sm:$0xff]  }
 0xd3c   : > { %2685 = vmatpush3.bf16.msra.mxu0 %v3124_v40 }
 0xd3d   : > { %v3138_v35 = vpop.eup %3137  ;;  %2686 = vmatprep.subr.bf16.mxu0 %v3126_v41  ;;  %2848 = vmatpush3.bf16.msra.mxu1 %v3134_v19 }
 0xd3e   : > { %v3140_v6 = vpop.eup %3139 }
 0xd3f   : > { %v3142_v9 = vpop.eup %3141 }
 0xd40   : > { %v3144_v36 = vpop.eup %3143  ;;  %v3084_v21 = vpack.i.bf16 %v3138_v35, %v3142_v9  ;;  %2687 = vmatpush3.bf16.msra.mxu0 %v3127_v47 }
 0xd41   : > { %v3089_v37 = vpack.i.bf16 %v3140_v6, %v3144_v36  ;;  %2688 = vmatprep.subr.bf16.mxu0 %v3129_v48 }
 0xd42   : > { %3085 = vrot.lane.b32.xlu0 %v3084_v21, %s3204_s25 }
 0xd43   : > { %3090 = vrot.lane.b32.xlu1 %v3089_v37, %s3205_s26 }
 0xd44   : > { %2689 = vmatpush3.bf16.msra.mxu0 %v3130_v53 }
 0xd45   : > { %2690 = vmatprep.subr.bf16.mxu0 %v3132_v0 }
 0xd48   : > { %2691 = vmatpush3.bf16.msra.mxu0 %v3133_v13 }
 0xd49   : > { %2692 = vmatprep.subr.bf16.mxu0 %v3135_v24 }
 0xd4c   : > { %2693 = vmatpush3.bf16.msra.mxu0 %v3136_v59 }
 0xdb4   : > { %v3086_v27 = vpop.permute.xlu0 %3085 }
 0xdb5   : > { %v3091_v30 = vpop.permute.xlu1 %3090  ;;  %v3088_v49 = vunpack.i.h.bf16 %v3086_v27  ;;  %v3087_v52 = vunpack.i.l.bf16 %v3086_v27 }
 0xdb6   : > { %v3093_v50 = vunpack.i.h.bf16 %v3091_v30  ;;  %v3092_v51 = vunpack.i.l.bf16 %v3091_v30 }
 0xdb8   : > { %v2162_v60 = vsel %vm2160_vm15, %v3088_v49, %v3093_v50  ;;  %v2161_v12 = vsel %vm2160_vm15, %v3087_v52, %v3092_v51 }
 0xdeb   : > { %v2124_v54 = vpop.f32.mrf.mxu0 }
 0xdec   : > { %v2125_v20 = vadd.f32 %v2124_v54, %v4022_v42 }
 0xded   : > { %v2839_v56 = vpop.f32.mrf.mxu0 }
 0xdee   : > { %3145 = vtanh.f32 %v2125_v20 }
 0xdef   : > { %v2127_v58 = vpop.f32.mrf.mxu0 }
 0xdf0   : > { %v2128_v10 = vadd.f32 %v2127_v58, %v4020_v45 }
 0xdf1   : > { %v2840_v17 = vpop.f32.mrf.mxu0 }
 0xdf2   : > { %3147 = vtanh.f32 %v2128_v10 }
 0xdf3   : > { %3149 = vtanh.f32 %v931_v25 }
 0xdf4   : > { %3151 = vtanh.f32 %v928_v61 }
 0xdfb   : > { %v3146_v7 = vpop.eup %3145 }
 0xdff   : > { %v3148_v55 = vpop.eup %3147 }
 0xe00   : > { %v3094_v46 = vpack.i.bf16 %v3148_v55, %v3146_v7  ;;  %v3150_v29 = vpop.eup %3149 }
 0xe01   : > { %v3152_v63 = vpop.eup %3151  ;;  %v2159_v18 = vsel %vm2157_vm14, %v3150_v29, %v3088_v49 }
 0xe02   : > { %3095 = vrot.lane.b32.xlu0 %v3094_v46, %s3206_s29  ;;  %v2158_v62 = vsel %vm2157_vm14, %v3152_v63, %v3087_v52 }
 0xe03   : > { %v2166_v44 = vpack.c.bf16 %v2159_v18, %v2158_v62 }
 0xe74   : > { %v3096_v16 = vpop.permute.xlu0 %3095 }
 0xe75   : > { %v3098_v26 = vunpack.i.h.bf16 %v3096_v16  ;;  %v3097_v3 = vunpack.i.l.bf16 %v3096_v16 }
 0xe77   : > { %v2168_v4 = vpack.c.bf16 %v3098_v26, %v3097_v3  ;;  %v2164_v33 = vsel %vm2163_vm0, %v2161_v12, %v3097_v3  ;;  %v2165_v8 = vsel %vm2163_vm0, %v2162_v60, %v3098_v26 }
 0xe78   : > { %v2167_v43 = vpack.c.bf16 %v2165_v8, %v2164_v33 }
 0xe79   : > { %2850 = vmatmul.mubr.msk.bf16.vlgmr.msra.gmra.mxu1 %vm2296_vm1, %v2168_v4 }
 0xe7a   : > { %2332 = vmatprep.mubr.bf16.mxu0 %v2167_v43 }
 0xe7b   : > { %2333 = vmatmul.mubr.bf16.vlgmr.msra.gmra.mxu0 %v2166_v44 }
 0xf39   : > { %v2375_v11 = vpop.f32.mrf.mxu1 }
 0xf3b   : > { %v2694_v45 = vpop.f32.mrf.mxu0  ;;  %v2851_v42 = vpop.f32.mrf.mxu1 }
 0xf3d   : > { %v2695_v15 = vpop.f32.mrf.mxu0  ;;  %v2378_v23 = vpop.f32.mrf.mxu1 }
 0xf3e   : > { %v2696_v34 = vadd.f32 %v2695_v15, %v2694_v45 }
 0xf3f   : > { %v2697_v35 = vpop.f32.mrf.mxu0  ;;  %v2852_v6 = vpop.f32.mrf.mxu1 }
 0xf40   : > { %v2335_v9 = vadd.f32 %v2696_v34, %v2508_v1 }
 0xf41   : > { %v2698_v36 = vpop.f32.mrf.mxu0 }
 0xf42   : > { %v2376_v21 = vadd.f32 %v2375_v11, %v2335_v9  ;;  %v2699_v37 = vadd.f32 %v2698_v36, %v2697_v35 }
 0xf44   : > { %v2530_v14 = vmul.f32 -1.442695, %v2376_v21  ;;  %v2338_v22 = vadd.f32 %v2699_v37, %v2508_v1 }
 0xf46   : > { %3153 = vpow2.f32 %v2530_v14  ;;  %v2379_v5 = vadd.f32 %v2378_v23, %v2338_v22 }
 0xf48   : > { %v2531_v57 = vmul.f32 -1.442695, %v2379_v5 }
 0xf4a   : > { %3155 = vpow2.f32 %v2531_v57 }
 0xf53   : > { %v3154_v28 = vpop.eup %3153 }
 0xf54   : > { %v2388_v31 = vadd.f32 1.0, %v3154_v28 }
 0xf56   : > { %3157 = vrcp.f32 %v2388_v31 }
 0xf57   : > { %v3156_v32 = vpop.eup %3155 }
 0xf58   : > { %v2389_v2 = vadd.f32 1.0, %v3156_v32 }
 0xf5a   : > { %3159 = vrcp.f32 %v2389_v2 }
 0xf63   : > { %v3158_v38 = vpop.eup %3157 }
 0xf64   : > { %2394 = vst [vmem:[%s310_s23] sm:$0xff] %v3158_v38 }
 0xf67   : > { %v3160_v39 = vpop.eup %3159 }
 0xf68   : > { %2395 = vst [vmem:[%s310_s23 + $0x8] sm:$0xff] %v3160_v39 }
 0xf69 PF: > { %s18_s27 = sadd.s32 1, %s3185_s27  }
 0xf6a   : > { %p15_p5 = scmp.ge.s32.totalorder %s18_s27, 4  }
 0xf6c   :  { %17 = sbr.rel (!%p15_p5) target bundleno = 1 (0x1), region = 85 }

</bundles_post_ra>
